<compile_context>
chip_gen: v6e
topology: v6e:2x2x1
jax: 0.10.0
libtpu: 0.0.40
codegen_flags: <defaults>
</compile_context>

<pallas_src>
import functools

import jax
import jax.numpy as jnp
from jax.experimental import pallas as pl
from jax.experimental.pallas import tpu as pltpu


def ffnn_kernel(x_ref, w1_ref, b1_ref, w2_ref, b2_ref, wo_ref, bo_ref, out_ref,
                *, lane_chunk, n_chunks):
    # x_ref : (TB, D)   f32  -- native batch-major activations, cast in-kernel
    # w1_ref: (H1, D)   bf16            b1_ref: (H1, LC) f32 (lane-broadcast)
    # w2_ref: (H2, H1)  bf16 (BN1 fold) b2_ref: (H2, LC) f32 (BN1 fold)
    # wo_ref: (H2, LC)  f32  (BN2 fold) bo_ref: (1, 1)   f32 in SMEM (BN2 fold)
    # out_ref: (1, TB)  f32  -- lane-dense output slab
    lc = lane_chunk
    bo = bo_ref[0, 0]
    # Fully-unrolled static lane-chunk loop (constant offsets -> static ref
    # slices, equivalent to lax.fori_loop(..., unroll=True)).  Chunking keeps
    # the (H1, LC) f32 intermediate inside the 64-vreg file (no VMEM spills).
    for c in range(n_chunks):
        off = c * lc
        xs = x_ref[pl.ds(off, lc), :].astype(jnp.bfloat16)            # (LC, D)
        # Layer 1: contract W1's D axis with x's D axis -> feature-major (H1, LC)
        # (batch on lanes) with no wrapper-side transpose of x.
        h = jax.lax.dot_general(
            w1_ref[...], xs,
            dimension_numbers=(((1,), (1,)), ((), ())),
            preferred_element_type=jnp.float32)                       # (H1, LC)
        h = jnp.maximum(h + b1_ref[...], 0.0)
        h = jnp.dot(w2_ref[...], h.astype(jnp.bfloat16),
                    preferred_element_type=jnp.float32)               # (H2, LC)
        h = jnp.maximum(h + b2_ref[...], 0.0)
        # Final [H2 -> 1] layer: VPU multiply + sublane reduce (XLU) -> lane-
        # dense (1, LC) stored at a static, 128-aligned lane offset.
        out_ref[:, pl.ds(off, lc)] = (
            jnp.sum(h * wo_ref[...], axis=0, keepdims=True) + bo)


def _fold_params(params):
    """Fold eval-mode BatchNorm (scale s, shift t) into the next layer."""
    hp = jax.lax.Precision.HIGHEST
    w1, b1 = params["w1"], params["b1"]          # (D, H1), (1, H1)
    w2, b2 = params["w2"], params["b2"]          # (H1, H2), (1, H2)
    wo, bo = params["wo"], params["bo"]          # (H2, 1), (1, 1)
    s1, t1 = params["s1"], params["t1"]          # (1, H1)
    s2, t2 = params["s2"], params["t2"]          # (1, H2)
    w2f = w2 * s1.T                              # row-scale of W2 by s1
    b2f = jnp.dot(t1, w2, precision=hp) + b2     # (1, H2)
    wof = wo * s2.T                              # (H2, 1)
    bof = jnp.dot(t2, wo, precision=hp) + bo     # (1, 1)
    return w1, b1, w2f, b2f, wof, bof


def prepare_params(params, lane_chunk=256):
    """One-time parameter prep (hoisted out of the per-call jitted path):
    fold eval-mode BN into the next layer, transpose/cast weights to the
    kernel's bf16 feature-major layout, and lane-broadcast biases/wo to the
    kernel's lane-chunk width so in-kernel adds are plain vreg ops."""
    w1, b1, w2f, b2f, wof, bof = _fold_params(params)
    H1 = w1.shape[1]
    H2 = w2f.shape[1]
    lc = lane_chunk
    return {
        "w1t": w1.T.astype(jnp.bfloat16),                                    # (H1, D)
        "b1c": jnp.broadcast_to(b1.T.astype(jnp.float32), (H1, lc)) + 0.0,   # (H1, LC)
        "w2t": w2f.T.astype(jnp.bfloat16),                                   # (H2, H1)
        "b2c": jnp.broadcast_to(b2f.T.astype(jnp.float32), (H2, lc)) + 0.0,  # (H2, LC)
        "wo_b": jnp.broadcast_to(wof.astype(jnp.float32), (H2, lc)) + 0.0,   # (H2, LC)
        "bo_s": bof.astype(jnp.float32),                                     # (1, 1) SMEM
    }


@functools.partial(jax.jit, static_argnames=("tb", "lane_chunk"))
def feedforward_nn_forward(x, prepared, tb=2048, lane_chunk=256):
    """x: [B, D_in] GNN-expanded features (f32, native layout). Returns [B]."""
    assert lane_chunk % 128 == 0, "lane chunk must be lane-aligned (multiple of 128)"
    assert tb % lane_chunk == 0, "batch tile must be a multiple of the lane chunk"
    B, D = x.shape
    H1 = prepared["w1t"].shape[0]
    H2 = prepared["w2t"].shape[0]
    lc = lane_chunk
    assert prepared["b1c"].shape == (H1, lc), "prepare_params lane width != lane_chunk"

    # Shapes are static under jit -> plain Python tile arithmetic.
    # Shrink the batch tile when B is small so we don't burn compute on a huge
    # masked tail; keep it a multiple of the lane chunk.
    tb_eff = min(tb, lc * (-(-B // lc)))
    n_chunks = tb_eff // lc
    num_tiles = -(-B // tb_eff)      # last block may be partial: Pallas masks
                                     # OOB reads/writes, so no jnp.pad pass.

    kernel = functools.partial(ffnn_kernel, lane_chunk=lc, n_chunks=n_chunks)
    out = pl.pallas_call(
        kernel,
        out_shape=jax.ShapeDtypeStruct((1, B), jnp.float32),
        grid=(num_tiles,),
        in_specs=[
            pl.BlockSpec((tb_eff, D), lambda i: (i, 0)),    # streamed activations (native f32)
            pl.BlockSpec((H1, D), lambda i: (0, 0)),        # resident weights
            pl.BlockSpec((H1, lc), lambda i: (0, 0)),
            pl.BlockSpec((H2, H1), lambda i: (0, 0)),
            pl.BlockSpec((H2, lc), lambda i: (0, 0)),
            pl.BlockSpec((H2, lc), lambda i: (0, 0)),
            pl.BlockSpec(memory_space=pltpu.MemorySpace.SMEM),
        ],
        out_specs=pl.BlockSpec((1, tb_eff), lambda i: (0, i)),   # lane-dense output
        compiler_params=pltpu.CompilerParams(
            dimension_semantics=("parallel",)),
    )(x, prepared["w1t"], prepared["b1c"], prepared["w2t"],
      prepared["b2c"], prepared["wo_b"], prepared["bo_s"])

    return out[0]                    # matches PyTorch `x.squeeze()`


def init_params(key, d_in, h1, h2):
    ks = jax.random.split(key, 10)

    def kaiming_normal(k, fan_in, shape):
        # nn.init.kaiming_normal_ on the PyTorch [out, in] weight; stored [in, out].
        return jax.random.normal(k, shape, jnp.float32) * jnp.sqrt(2.0 / fan_in)

    def linear_bias(k, fan_in, n):
        bound = 1.0 / jnp.sqrt(float(fan_in))
        return jax.random.uniform(k, (1, n), jnp.float32, -bound, bound)

    def bn_eval_fold(km, kv, n):
        # BatchNorm1d eval: y = (x - mean) / sqrt(var + eps) * gamma + beta
        gamma = jnp.ones((1, n), jnp.float32)
        beta = jnp.zeros((1, n), jnp.float32)
        running_mean = 0.1 * jax.random.normal(km, (1, n), jnp.float32)
        running_var = 1.0 + 0.1 * jnp.abs(jax.random.normal(kv, (1, n), jnp.float32))
        eps = 1e-5
        scale = gamma / jnp.sqrt(running_var + eps)
        shift = beta - running_mean * scale
        return scale, shift

    s1, t1 = bn_eval_fold(ks[6], ks[7], h1)
    s2, t2 = bn_eval_fold(ks[8], ks[9], h2)
    return {
        "w1": kaiming_normal(ks[0], d_in, (d_in, h1)),
        "b1": linear_bias(ks[1], d_in, h1),
        "s1": s1, "t1": t1,
        "w2": kaiming_normal(ks[2], h1, (h1, h2)),
        "b2": linear_bias(ks[3], h1, h2),
        "s2": s2, "t2": t2,
        "wo": kaiming_normal(ks[4], h2, (h2, 1)),
        "bo": linear_bias(ks[5], h2, 1),
    }


def _reference_emulated(x, params):
    """Precision-matched reference: BN folded, bf16 operands, f32 accumulation."""
    w1, b1, w2f, b2f, wof, bof = _fold_params(params)
    h = jnp.dot(x.astype(jnp.bfloat16), w1.astype(jnp.bfloat16),
                preferred_element_type=jnp.float32) + b1
    h = jnp.maximum(h, 0.0)
    h = jnp.dot(h.astype(jnp.bfloat16), w2f.astype(jnp.bfloat16),
                preferred_element_type=jnp.float32) + b2f
    h = jnp.maximum(h, 0.0)
    out = jnp.sum(h * wof[:, 0], axis=-1) + bof[0, 0]
    return jnp.squeeze(out)


def _reference_f32(x, p):
    """Original (unfolded, full-f32) semantics."""
    hp = jax.lax.Precision.HIGHEST
    h = jnp.maximum(jnp.dot(x, p["w1"], precision=hp) + p["b1"], 0.0) * p["s1"] + p["t1"]
    h = jnp.maximum(jnp.dot(h, p["w2"], precision=hp) + p["b2"], 0.0) * p["s2"] + p["t2"]
    return jnp.squeeze(jnp.dot(h, p["wo"], precision=hp) + p["bo"])


if __name__ == "__main__":
    B, D_IN = 384, 32            # D_in = nets.output_dims (GNNNode output_layer size 32)
    H1, H2 = 128, 64             # lin_layer_sizes=[128, 64]
    LC = 128                     # small lane chunk for the demo (exercises the chunk loop)

    key = jax.random.PRNGKey(0)
    kx, kp = jax.random.split(key)
    x = jax.random.normal(kx, (B, D_IN), jnp.float32)   # GNN-expanded features
    params = init_params(kp, D_IN, H1, H2)
    prepared = prepare_params(params, lane_chunk=LC)    # fold/cast/broadcast once

    # tb=256, lane_chunk=128 -> 2 batch tiles (last one partial, masked by
    # Pallas) x 2 in-kernel lane chunks per tile; no pad/cast/transpose of x.
    out = feedforward_nn_forward(x, prepared, tb=256, lane_chunk=LC)
    out = jax.block_until_ready(out)
    assert out.shape == (B,), out.shape

    ref_e = _reference_emulated(x, params)              # same numerics as the kernel
    ref_f = _reference_f32(x, params)                   # original f32 semantics
    assert jnp.allclose(out, ref_e, atol=1e-3, rtol=1e-3), "mismatch vs precision-matched ref"
    assert jnp.allclose(out, ref_f, atol=0.15, rtol=0.05), "mismatch vs f32 reference"
    print("KERNEL_OK")
</pallas_src>

<mosaic_0001>
module attributes {stable_mosaic.version = 11 : i64} {
  func.func @ffnn_kernel(%arg0: i32, %arg1: memref<256x32xf32, #tpu.memory_space<vmem>>, %arg2: memref<128x32xbf16, #tpu.memory_space<vmem>>, %arg3: memref<128x128xf32, #tpu.memory_space<vmem>>, %arg4: memref<64x128xbf16, #tpu.memory_space<vmem>>, %arg5: memref<64x128xf32, #tpu.memory_space<vmem>>, %arg6: memref<64x128xf32, #tpu.memory_space<vmem>>, %arg7: memref<1x1xf32, #tpu.memory_space<smem>>, %arg8: memref<1x256xf32, #tpu.memory_space<vmem>>) attributes {dimension_semantics = [#tpu.dimension_semantics<parallel>], iteration_bounds = array<i64: 2>, scalar_prefetch = 0 : i64, scratch_operands = 0 : i64, tpu.core_type = #tpu.core_type<tc>, window_params = [{transform_indices = @transform_0, window_bounds = array<i64: 256, 32>}, {pipeline_mode = #tpu.pipeline_mode<synchronous>, transform_indices = @transform_1, window_bounds = array<i64: 128, 32>}, {pipeline_mode = #tpu.pipeline_mode<synchronous>, transform_indices = @transform_2, window_bounds = array<i64: 128, 128>}, {pipeline_mode = #tpu.pipeline_mode<synchronous>, transform_indices = @transform_3, window_bounds = array<i64: 64, 128>}, {pipeline_mode = #tpu.pipeline_mode<synchronous>, transform_indices = @transform_4, window_bounds = array<i64: 64, 128>}, {pipeline_mode = #tpu.pipeline_mode<synchronous>, transform_indices = @transform_5, window_bounds = array<i64: 64, 128>}, {transform_indices = @transform_6, window_bounds = array<i64: 1, 1>}, {transform_indices = @transform_7, window_bounds = array<i64: 1, 256>}]} {
    %c0 = arith.constant 0 : index
    %c0_0 = arith.constant 0 : index
    %0 = memref.load %arg7[%c0, %c0_0] : memref<1x1xf32, #tpu.memory_space<smem>>
    %c0_1 = arith.constant 0 : index
    %c0_2 = arith.constant 0 : index
    %1 = vector.load %arg1[%c0_1, %c0_2] : memref<256x32xf32, #tpu.memory_space<vmem>>, vector<128x32xf32>
    %2 = arith.truncf %1 : vector<128x32xf32> to vector<128x32xbf16>
    %c0_3 = arith.constant 0 : index
    %c0_4 = arith.constant 0 : index
    %3 = vector.load %arg2[%c0_3, %c0_4] : memref<128x32xbf16, #tpu.memory_space<vmem>>, vector<128x32xbf16>
    %cst = arith.constant dense<0.000000e+00> : vector<128x128xf32>
    %4 = tpu.matmul %3, %2, %cst {dimension_numbers = #tpu.dot_dimension_numbers<[1], [1], [0], [0], [0, 0, 1, 0], [], []>} : vector<128x32xbf16>, vector<128x32xbf16>, vector<128x128xf32> -> vector<128x128xf32>
    %c0_5 = arith.constant 0 : index
    %c0_6 = arith.constant 0 : index
    %5 = vector.load %arg3[%c0_5, %c0_6] : memref<128x128xf32, #tpu.memory_space<vmem>>, vector<128x128xf32>
    %6 = arith.addf %4, %5 : vector<128x128xf32>
    %cst_7 = arith.constant 0.000000e+00 : f32
    %7 = vector.broadcast %cst_7 : f32 to vector<128x128xf32>
    %8 = arith.maximumf %6, %7 : vector<128x128xf32>
    %c0_8 = arith.constant 0 : index
    %c0_9 = arith.constant 0 : index
    %9 = vector.load %arg4[%c0_8, %c0_9] : memref<64x128xbf16, #tpu.memory_space<vmem>>, vector<64x128xbf16>
    %10 = arith.truncf %8 : vector<128x128xf32> to vector<128x128xbf16>
    %cst_10 = arith.constant dense<0.000000e+00> : vector<64x128xf32>
    %11 = tpu.matmul %9, %10, %cst_10 {dimension_numbers = #tpu.dot_dimension_numbers<[1], [0], [0], [1], [0, 0, 1, 1], [], []>} : vector<64x128xbf16>, vector<128x128xbf16>, vector<64x128xf32> -> vector<64x128xf32>
    %c0_11 = arith.constant 0 : index
    %c0_12 = arith.constant 0 : index
    %12 = vector.load %arg5[%c0_11, %c0_12] : memref<64x128xf32, #tpu.memory_space<vmem>>, vector<64x128xf32>
    %13 = arith.addf %11, %12 : vector<64x128xf32>
    %cst_13 = arith.constant 0.000000e+00 : f32
    %14 = vector.broadcast %cst_13 : f32 to vector<64x128xf32>
    %15 = arith.maximumf %13, %14 : vector<64x128xf32>
    %c0_14 = arith.constant 0 : index
    %c0_15 = arith.constant 0 : index
    %16 = vector.load %arg6[%c0_14, %c0_15] : memref<64x128xf32, #tpu.memory_space<vmem>>, vector<64x128xf32>
    %17 = arith.mulf %15, %16 : vector<64x128xf32>
    %cst_16 = arith.constant dense<0.000000e+00> : vector<128xf32>
    %18 = vector.multi_reduction <add>, %17, %cst_16 [0] : vector<64x128xf32> to vector<128xf32>
    %19 = vector.shape_cast %18 : vector<128xf32> to vector<1x128xf32>
    %20 = vector.broadcast %0 : f32 to vector<1x128xf32>
    %21 = arith.addf %19, %20 : vector<1x128xf32>
    %c0_17 = arith.constant 0 : index
    %c0_18 = arith.constant 0 : index
    %22 = vector.load %arg8[%c0_17, %c0_18] : memref<1x256xf32, #tpu.memory_space<vmem>>, vector<1x128xf32>
    tpu.vector_store %arg8[%c0_17, %c0_18], %21 {strides = array<i32>} : memref<1x256xf32, #tpu.memory_space<vmem>>, vector<1x128xf32>,
    %c128 = arith.constant 128 : index
    %c0_19 = arith.constant 0 : index
    %23 = vector.load %arg1[%c128, %c0_19] : memref<256x32xf32, #tpu.memory_space<vmem>>, vector<128x32xf32>
    %24 = arith.truncf %23 : vector<128x32xf32> to vector<128x32xbf16>
    %c0_20 = arith.constant 0 : index
    %c0_21 = arith.constant 0 : index
    %25 = vector.load %arg2[%c0_20, %c0_21] : memref<128x32xbf16, #tpu.memory_space<vmem>>, vector<128x32xbf16>
    %cst_22 = arith.constant dense<0.000000e+00> : vector<128x128xf32>
    %26 = tpu.matmul %25, %24, %cst_22 {dimension_numbers = #tpu.dot_dimension_numbers<[1], [1], [0], [0], [0, 0, 1, 0], [], []>} : vector<128x32xbf16>, vector<128x32xbf16>, vector<128x128xf32> -> vector<128x128xf32>
    %c0_23 = arith.constant 0 : index
    %c0_24 = arith.constant 0 : index
    %27 = vector.load %arg3[%c0_23, %c0_24] : memref<128x128xf32, #tpu.memory_space<vmem>>, vector<128x128xf32>
    %28 = arith.addf %26, %27 : vector<128x128xf32>
    %cst_25 = arith.constant 0.000000e+00 : f32
    %29 = vector.broadcast %cst_25 : f32 to vector<128x128xf32>
    %30 = arith.maximumf %28, %29 : vector<128x128xf32>
    %c0_26 = arith.constant 0 : index
    %c0_27 = arith.constant 0 : index
    %31 = vector.load %arg4[%c0_26, %c0_27] : memref<64x128xbf16, #tpu.memory_space<vmem>>, vector<64x128xbf16>
    %32 = arith.truncf %30 : vector<128x128xf32> to vector<128x128xbf16>
    %cst_28 = arith.constant dense<0.000000e+00> : vector<64x128xf32>
    %33 = tpu.matmul %31, %32, %cst_28 {dimension_numbers = #tpu.dot_dimension_numbers<[1], [0], [0], [1], [0, 0, 1, 1], [], []>} : vector<64x128xbf16>, vector<128x128xbf16>, vector<64x128xf32> -> vector<64x128xf32>
    %c0_29 = arith.constant 0 : index
    %c0_30 = arith.constant 0 : index
    %34 = vector.load %arg5[%c0_29, %c0_30] : memref<64x128xf32, #tpu.memory_space<vmem>>, vector<64x128xf32>
    %35 = arith.addf %33, %34 : vector<64x128xf32>
    %cst_31 = arith.constant 0.000000e+00 : f32
    %36 = vector.broadcast %cst_31 : f32 to vector<64x128xf32>
    %37 = arith.maximumf %35, %36 : vector<64x128xf32>
    %c0_32 = arith.constant 0 : index
    %c0_33 = arith.constant 0 : index
    %38 = vector.load %arg6[%c0_32, %c0_33] : memref<64x128xf32, #tpu.memory_space<vmem>>, vector<64x128xf32>
    %39 = arith.mulf %37, %38 : vector<64x128xf32>
    %cst_34 = arith.constant dense<0.000000e+00> : vector<128xf32>
    %40 = vector.multi_reduction <add>, %39, %cst_34 [0] : vector<64x128xf32> to vector<128xf32>
    %41 = vector.shape_cast %40 : vector<128xf32> to vector<1x128xf32>
    %42 = vector.broadcast %0 : f32 to vector<1x128xf32>
    %43 = arith.addf %41, %42 : vector<1x128xf32>
    %c0_35 = arith.constant 0 : index
    %c128_36 = arith.constant 128 : index
    %44 = vector.load %arg8[%c0_35, %c128_36] : memref<1x256xf32, #tpu.memory_space<vmem>>, vector<1x128xf32>
    tpu.vector_store %arg8[%c0_35, %c128_36], %43 {strides = array<i32>} : memref<1x256xf32, #tpu.memory_space<vmem>>, vector<1x128xf32>,
    return
  }
  func.func @transform_0(%arg0: i32) -> (i32, i32) {
    %c0_i32 = arith.constant 0 : i32
    %c0_i32_0 = arith.constant 0 : i32
    return %arg0, %c0_i32 : i32, i32
  }
  func.func @transform_1(%arg0: i32) -> (i32, i32) {
    %c0_i32 = arith.constant 0 : i32
    %c0_i32_0 = arith.constant 0 : i32
    %c0_i32_1 = arith.constant 0 : i32
    return %c0_i32, %c0_i32_0 : i32, i32
  }
  func.func @transform_2(%arg0: i32) -> (i32, i32) {
    %c0_i32 = arith.constant 0 : i32
    %c0_i32_0 = arith.constant 0 : i32
    %c0_i32_1 = arith.constant 0 : i32
    return %c0_i32, %c0_i32_0 : i32, i32
  }
  func.func @transform_3(%arg0: i32) -> (i32, i32) {
    %c0_i32 = arith.constant 0 : i32
    %c0_i32_0 = arith.constant 0 : i32
    %c0_i32_1 = arith.constant 0 : i32
    return %c0_i32, %c0_i32_0 : i32, i32
  }
  func.func @transform_4(%arg0: i32) -> (i32, i32) {
    %c0_i32 = arith.constant 0 : i32
    %c0_i32_0 = arith.constant 0 : i32
    %c0_i32_1 = arith.constant 0 : i32
    return %c0_i32, %c0_i32_0 : i32, i32
  }
  func.func @transform_5(%arg0: i32) -> (i32, i32) {
    %c0_i32 = arith.constant 0 : i32
    %c0_i32_0 = arith.constant 0 : i32
    %c0_i32_1 = arith.constant 0 : i32
    return %c0_i32, %c0_i32_0 : i32, i32
  }
  func.func @transform_6(%arg0: i32) -> (i32, i32) {
    %c0_i32 = arith.constant 0 : i32
    %c0_i32_0 = arith.constant 0 : i32
    %c0_i32_1 = arith.constant 0 : i32
    return %c0_i32, %c0_i32_0 : i32, i32
  }
  func.func @transform_7(%arg0: i32) -> (i32, i32) {
    %c0_i32 = arith.constant 0 : i32
    %c0_i32_0 = arith.constant 0 : i32
    return %c0_i32, %arg0 : i32, i32
  }
}

</mosaic_0001>

<bundles_post_ra>
// kernel: feedforward_nn_forward.1
= control target key start
LH: loop header
LB: loop body
LE: loop exit
PB: predicated region body
PF: predicated region fallthrough
CT: control target
= control target key end

     0   :  { %s3177_s0 = inlined_call_operand.vmem [shape: f32[384,32], index: 0, kind: input, shape index: {}]   ;;  %s3178_s1 = inlined_call_operand.vmem [shape: bf16[128,32], index: 1, kind: input, shape index: {}]   ;;  %s3179_s2 = inlined_call_operand.vmem [shape: f32[128,128], index: 2, kind: input, shape index: {}]   ;;  %s3180_s3 = inlined_call_operand.vmem [shape: bf16[64,128], index: 3, kind: input, shape index: {}]   ;;  %s3181_s4 = inlined_call_operand.vmem [shape: f32[64,128], index: 4, kind: input, shape index: {}]   ;;  %s3182_s5 = inlined_call_operand.vmem [shape: f32[64,128], index: 5, kind: input, shape index: {}]   ;;  %s3183_s6 = inlined_call_operand.<no memory space> [shape: f32[1,1], index: 6, kind: input, shape index: {}]   ;;  %s3184_s7 = inlined_call_operand.vmem [shape: f32[1,384], index: 7, kind: output, shape index: {}]  }
   0x1   :  { %12 = sst [smem:[#allocation2]] %s3183_s6 }
   0x2   :  { %s2315_s26 = smov 0   ;;  %s2317_s27 = smov 0  }
   0x3   :  { %s2319_s28 = smov 0  }
   0x4 LB: > { %s2328_s6 = sadd.s32 4294967295, %s2204_s28   ;;  %s2330_s29 = sadd.s32 1, %s2204_s28   ;;  %s2204_s28 = sphi %s2319_s28, %s3200_s28   ;;  %s2200_s27 = sphi %s2317_s27, %s3199_s27   ;;  %s2196_s26 = sphi %s2315_s26, %s3198_s26  }
   0x5   : > { %s174_s30 = ssub.s32 %s2204_s28, %s2330_s29  ;;  %s177_s8 = sadd.s32 1, %s2200_s27 }
   0x6   : > { %p175_p0 = scmp.eq.s32.totalorder %s174_s30, 0  ;;  %p187_p1 = scmp.ne.s32.totalorder %s2200_s27, %s2196_s26 }
   0x7   : > { %p188_p2 = scmp.eq.s32.totalorder %s2328_s6, 1  ;;  %p1679_p3 = scmp.ge.s32.totalorder %s2204_s28, 1 }
   0x8   : > { %s2338_s9 = scalar_select %p175_p0, %s2200_s27, %s177_s8  }
   0x9   : > { %p2340_p4 = por %p188_p2, %p187_p1  ;;  %p247_p5 = scmp.lt.s32.totalorder %s2204_s28, 3 }
   0xb   : > { %p248_p6 = pnand %p1679_p3, %p247_p5 }
   0xc   : > { %s1681_s11 = sshll.u32 (!%p248_p6), %s2328_s6, 5  ;;  %s2694_s16 = sld [smem:[#allocation2]] (!%p248_p6) }
   0xd   : > { %251 = sbr.rel (%p248_p6) target bundleno = 1050 (0x41a), region = 48  ;;  %p287_p7 = scmp.lt.s32.totalorder (!%p248_p6), %s1681_s11, 47 }
   0xe   : > { %s279_s18 = sand.u32 (!%p248_p6), 1, %s2196_s26  }
   0xf   : > { %s1680_s19 = sshll.u32 (!%p248_p6), %s279_s18, 1 }
  0x10   : > { %s2704_s20 = scalar_lea.vmem (!%p248_p6), [#allocation3], %s1680_s19  }
  0x12   : > { %v2094_v0 = vld [vmem:[%s3178_s1] sm:$0xff]   ;;  %vm399_vm0 = vcmask 261120   ;;  %s3202_s11 = smov (!%p287_p7, %s1681_s11), 47  ;;  %v2095_v33 = vld [vmem:[%s3178_s1 + $0x8] sm:$0xff]   ;;  %v2096_v34 = vld [vmem:[%s3178_s1 + $0x10] sm:$0xff]   ;;  %s1724_s28 = sshll.u32 (%p2340_p4), %s2328_s6, 1 }
  0x13   : > { %1828 = vmatprep.mubr.msk.bf16.mxu0 %vm399_vm0, %v2094_v0  ;;  %s1682_s14 = sshll.u32 %s3202_s11, 3  ;;  %v2097_v35 = vld [vmem:[%s3178_s1 + $0x18] sm:$0xff]   ;;  %v2098_v36 = vld [vmem:[%s3178_s1 + $0x20] sm:$0xff]   ;;  %v2099_v37 = vld [vmem:[%s3178_s1 + $0x28] sm:$0xff]   ;;  %s2761_s11 = scalar_lea.vmem (%p2340_p4), %s3184_s7, %s1724_s28  }
  0x14   : > { %s2352_s17 = scalar_lea.vmem %s3177_s0, %s1682_s14  ;;  %v2100_v38 = vld [vmem:[%s3178_s1 + $0x30] sm:$0xff]   ;;  %v2101_v39 = vld [vmem:[%s3178_s1 + $0x38] sm:$0xff]   ;;  %v2102_v40 = vld [vmem:[%s3180_s3] sm:$0xff]  }
  0x15   : > { %v317_v1 = vld [vmem:[%s2352_s17 + $0x70] sm:$0xff]  ;;  %v318_v2 = vld [vmem:[%s2352_s17 + $0x78] sm:$0xff]  ;;  %v315_v3 = vld [vmem:[%s2352_s17 + $0x60] sm:$0xff]  ;;  %1860 = vmatprep.mubr.bf16.mxu1 %v2102_v40 }
  0x16   : > { %v326_v4 = vpack.c.bf16 %v318_v2, %v317_v1  ;;  %v316_v5 = vld [vmem:[%s2352_s17 + $0x68] sm:$0xff]  ;;  %v313_v6 = vld [vmem:[%s2352_s17 + $0x50] sm:$0xff]  ;;  %v314_v7 = vld [vmem:[%s2352_s17 + $0x58] sm:$0xff] }
  0x17   : > { %v325_v8 = vpack.c.bf16 %v316_v5, %v315_v3  ;;  %v324_v10 = vpack.c.bf16 %v314_v7, %v313_v6  ;;  %v311_v13 = vld [vmem:[%s2352_s17 + $0x40] sm:$0xff]  ;;  %v312_v14 = vld [vmem:[%s2352_s17 + $0x48] sm:$0xff]  ;;  %v309_v16 = vld [vmem:[%s2352_s17 + $0x30] sm:$0xff] }
  0x18   : > { %1924 = vmatprep.subr.msk.bf16.mxu0 %vm399_vm0, %v326_v4  ;;  %v446_v9 = vsel %vm399_vm0, %v326_v4, 0  ;;  %v323_v15 = vpack.c.bf16 %v312_v14, %v311_v13  ;;  %v310_v17 = vld [vmem:[%s2352_s17 + $0x38] sm:$0xff]  ;;  %v307_v20 = vld [vmem:[%s2352_s17 + $0x20] sm:$0xff]  ;;  %v308_v21 = vld [vmem:[%s2352_s17 + $0x28] sm:$0xff] }
  0x19   : > { %1813 = vmatpush3.bf16.xpose.msra.mxu0 %v446_v9  ;;  %v443_v11 = vsel %vm399_vm0, %v325_v8, 0  ;;  %v440_v12 = vsel %vm399_vm0, %v324_v10, 0  ;;  %v322_v19 = vpack.c.bf16 %v310_v17, %v309_v16  ;;  %v321_v23 = vpack.c.bf16 %v308_v21, %v307_v20  ;;  %v305_v24 = vld [vmem:[%s2352_s17 + $0x10] sm:$0xff]  ;;  %v306_v25 = vld [vmem:[%s2352_s17 + $0x18] sm:$0xff]  ;;  %v303_v28 = vld [vmem:[%s2352_s17] sm:$0xff] }
  0x1a   : > { %1925 = vmatprep.subr.msk.bf16.mxu0 %vm399_vm0, %v325_v8  ;;  %v437_v18 = vsel %vm399_vm0, %v323_v15, 0  ;;  %v320_v27 = vpack.c.bf16 %v306_v25, %v305_v24  ;;  %v304_v29 = vld [vmem:[%s2352_s17 + $0x8] sm:$0xff]  ;;  %v2426_v53 = vld [vmem:[%s3179_s2 + $0x70] sm:$0xff]  ;;  %v2431_v56 = vld [vmem:[%s3179_s2 + $0x60] sm:$0xff] }
  0x1b   : > { %v434_v22 = vsel %vm399_vm0, %v322_v19, 0  ;;  %v431_v26 = vsel %vm399_vm0, %v321_v23, 0  ;;  %v319_v31 = vpack.c.bf16 %v304_v29, %v303_v28  ;;  %v2436_v57 = vld [vmem:[%s3179_s2 + $0x78] sm:$0xff]  ;;  %v2447_v61 = vld [vmem:[%s3179_s2 + $0x68] sm:$0xff]  ;;  %v2454_v0 = vld [vmem:[%s3179_s2 + $0x50] sm:$0xff] }
  0x1c   : > { %v428_v30 = vsel %vm399_vm0, %v320_v27, 0  ;;  %v2442_v59 = vld [vmem:[%s3179_s2 + $0x58] sm:$0xff]  ;;  %v2461_v6 = vld [vmem:[%s3179_s2 + $0x48] sm:$0xff]  ;;  %v2491_v25 = vld [vmem:[%s3179_s2 + $0x20] sm:$0xff] }
  0x1d   : > { %v425_v32 = vsel %vm399_vm0, %v319_v31, 0  ;;  %v2497_v29 = vld [vmem:[%s3179_s2 + $0x18] sm:$0xff] }
  0x21   : > { %1815 = vmatpush3.bf16.xpose.msra.mxu0 %v443_v11  ;;  %v2467_v11 = vld [vmem:[%s3179_s2 + $0x40] sm:$0xff] }
  0x22   : > { %1926 = vmatprep.subr.msk.bf16.mxu0 %vm399_vm0, %v324_v10 }
  0x29   : > { %1817 = vmatpush3.bf16.xpose.msra.mxu0 %v440_v12 }
  0x2a   : > { %1927 = vmatprep.subr.msk.bf16.mxu0 %vm399_vm0, %v323_v15  ;;  %v2473_v15 = vld [vmem:[%s3179_s2 + $0x38] sm:$0xff] }
  0x31   : > { %1819 = vmatpush3.bf16.xpose.msra.mxu0 %v437_v18  ;;  %v2479_v18 = vld [vmem:[%s3179_s2 + $0x30] sm:$0xff] }
  0x32   : > { %1928 = vmatprep.subr.msk.bf16.mxu0 %vm399_vm0, %v322_v19 }
  0x39   : > { %1821 = vmatpush3.bf16.xpose.msra.mxu0 %v434_v22  ;;  %v2485_v22 = vld [vmem:[%s3179_s2 + $0x28] sm:$0xff] }
  0x3a   : > { %1929 = vmatprep.subr.msk.bf16.mxu0 %vm399_vm0, %v321_v23 }
  0x41   : > { %1823 = vmatpush3.bf16.xpose.msra.mxu0 %v431_v26 }
  0x42   : > { %1930 = vmatprep.subr.msk.bf16.mxu0 %vm399_vm0, %v320_v27 }
  0x49   : > { %1825 = vmatpush3.bf16.xpose.msra.mxu0 %v428_v30 }
  0x4a   : > { %1931 = vmatprep.subr.msk.bf16.mxu0 %vm399_vm0, %v319_v31 }
  0x51   : > { %1827 = vmatpush3.bf16.xpose.msra.mxu0 %v425_v32  ;;  %v2503_v32 = vld [vmem:[%s3179_s2 + $0x10] sm:$0xff] }
  0x58   : > { %1829 = vmatmul.mubr.msk.bf16.vlgmr.msra.gmra.mxu0 %vm399_vm0, %v2095_v33 }
  0x59   : > { %1832 = vmatprep.mubr.msk.bf16.mxu0 %vm399_vm0, %v2096_v34 }
  0x60   : > { %1833 = vmatmul.mubr.msk.bf16.gmra.mxu0 %vm399_vm0, %v2097_v35 }
  0x61   : > { %1836 = vmatprep.mubr.msk.bf16.mxu0 %vm399_vm0, %v2098_v36  ;;  %v2509_v36 = vld [vmem:[%s3179_s2 + $0x8] sm:$0xff] }
  0x68   : > { %1837 = vmatmul.mubr.msk.bf16.gmra.mxu0 %vm399_vm0, %v2099_v37 }
  0x69   : > { %1840 = vmatprep.mubr.msk.bf16.mxu0 %vm399_vm0, %v2100_v38 }
  0x70   : > { %1841 = vmatmul.mubr.msk.bf16.gmra.mxu0 %vm399_vm0, %v2101_v39  ;;  %v2516_v39 = vld [vmem:[%s3179_s2] sm:$0xff] }
 0x118   : > { %v2417_v41 = vpop.f32.mrf.mxu0 }
 0x119   : > { %v491_v37 = vadd.f32 %v2417_v41, %v2503_v32 }
 0x11a   : > { %v2419_v42 = vpop.f32.mrf.mxu0 }
 0x11b   : > { %v483_v41 = vadd.f32 %v2419_v42, %v2516_v39  ;;  %v2103_v42 = vld [vmem:[%s3180_s3 + $0x8] sm:$0xff]  }
 0x11c   : > { %v1831_v43 = vpop.f32.mrf.mxu0 }
 0x11d   : > { %v494_v33 = vadd.f32 %v1831_v43, %v2497_v29 }
 0x11e   : > { %v2421_v44 = vpop.f32.mrf.mxu0 }
 0x11f   : > { %v548_v40 = vmax.f32 %v494_v33, 0.0  ;;  %v486_v43 = vadd.f32 %v2421_v44, %v2509_v36 }
 0x120   : > { %v1834_v45 = vpop.f32.mrf.mxu0 }
 0x121   : > { %v507_v23 = vadd.f32 %v1834_v45, %v2479_v18 }
 0x122   : > { %v498_v46 = vpop.f32.mrf.mxu0 }
 0x123   : > { %v551_v30 = vmax.f32 %v507_v23, 0.0  ;;  %v499_v31 = vadd.f32 %v498_v46, %v2491_v25  ;;  %v547_v46 = vmax.f32 %v491_v37, 0.0  ;;  %v720_v23 = vld [vmem:[%s2352_s17 + $0x90] sm:$0xff] }
 0x124   : > { %v1835_v47 = vpop.f32.mrf.mxu0  ;;  %v2108_v37 = vld [vmem:[%s3178_s1 + $0x10] sm:$0xff]  }
 0x125   : > { %v510_v19 = vadd.f32 %v1835_v47, %v2473_v15  ;;  %v549_v38 = vmax.f32 %v499_v31, 0.0  ;;  %v570_v47 = vpack.c.bf16 %v548_v40, %v547_v46  ;;  %v2110_v40 = vld [vmem:[%s3178_s1 + $0x20] sm:$0xff]   ;;  %v2113_v46 = vld [vmem:[%s3178_s1 + $0x38] sm:$0xff]  }
 0x126   : > { %v501_v48 = vpop.f32.mrf.mxu0 }
 0x127   : > { %v552_v26 = vmax.f32 %v510_v19, 0.0  ;;  %v502_v27 = vadd.f32 %v501_v48, %v2485_v22  ;;  %v546_v48 = vmax.f32 %v486_v43, 0.0  ;;  %v723_v19 = vld [vmem:[%s2352_s17 + $0xa8] sm:$0xff] }
 0x128   : > { %v1838_v49 = vpop.f32.mrf.mxu0  ;;  %v2111_v43 = vld [vmem:[%s3178_s1 + $0x28] sm:$0xff]  }
 0x129   : > { %v523_v7 = vadd.f32 %v1838_v49, %v2454_v0  ;;  %v572_v34 = vpack.c.bf16 %v552_v26, %v551_v30  ;;  %v550_v35 = vmax.f32 %v502_v27, 0.0  ;;  %v545_v49 = vmax.f32 %v483_v41, 0.0  ;;  %v719_v30 = vld [vmem:[%s2352_s17 + $0x88] sm:$0xff] }
 0x12a   : > { %v514_v50 = vpop.f32.mrf.mxu0 }
 0x12b   : > { %v555_v16 = vmax.f32 %v523_v7, 0.0  ;;  %v515_v17 = vadd.f32 %v514_v50, %v2467_v11  ;;  %v571_v45 = vpack.c.bf16 %v550_v35, %v549_v38  ;;  %v732_v50 = vld [vmem:[%s2352_s17 + $0xf0] sm:$0xff]  ;;  %v726_v7 = vld [vmem:[%s2352_s17 + $0xc0] sm:$0xff]  ;;  %v2107_v35 = vld [vmem:[%s3178_s1 + $0x8] sm:$0xff]  }
 0x12c   : > { %v1839_v51 = vpop.f32.mrf.mxu0  ;;  %v2109_v38 = vld [vmem:[%s3178_s1 + $0x18] sm:$0xff]  }
 0x12d   : > { %v526_v2 = vadd.f32 %v1839_v51, %v2442_v59  ;;  %v553_v24 = vmax.f32 %v515_v17, 0.0  ;;  %v733_v51 = vld [vmem:[%s2352_s17 + $0xf8] sm:$0xff]  ;;  %v722_v17 = vld [vmem:[%s2352_s17 + $0xa0] sm:$0xff] }
 0x12e   : > { %v517_v52 = vpop.f32.mrf.mxu0  ;;  %v741_v44 = vpack.c.bf16 %v733_v51, %v732_v50 }
 0x12f   : > { %v556_v12 = vmax.f32 %v526_v2, 0.0  ;;  %v518_v13 = vadd.f32 %v517_v52, %v2461_v6  ;;  %v569_v52 = vpack.c.bf16 %v546_v48, %v545_v49  ;;  %v2105_v2 = vld [vmem:[%s3180_s3 + $0x18] sm:$0xff]   ;;  %v2114_v48 = vld [vmem:[%s3180_s3] sm:$0xff]   ;;  %v2606_v49 = vld [vmem:[%s3181_s4 + $0x10] sm:$0xff] }
 0x130   : > { %v1842_v54 = vpop.f32.mrf.mxu0  ;;  %1916 = vmatprep.mubr.bf16.mxu0 %v2114_v48 }
 0x131   : > { %v539_v58 = vadd.f32 %v1842_v54, %v2426_v53  ;;  %v574_v20 = vpack.c.bf16 %v556_v12, %v555_v16  ;;  %v554_v21 = vmax.f32 %v518_v13, 0.0  ;;  %v730_v54 = vld [vmem:[%s2352_s17 + $0xe0] sm:$0xff]  ;;  %v724_v12 = vld [vmem:[%s2352_s17 + $0xb0] sm:$0xff]  ;;  %v725_v13 = vld [vmem:[%s2352_s17 + $0xb8] sm:$0xff] }
 0x132   : > { %v530_v55 = vpop.f32.mrf.mxu0  ;;  %v737_v16 = vpack.c.bf16 %v725_v13, %v724_v12  ;;  %v2650_v12 = vld [vmem:[%s3181_s4 + $0x38] sm:$0xff] }
 0x133   : > { %v531_v62 = vadd.f32 %v530_v55, %v2431_v56  ;;  %v559_v3 = vmax.f32 %v539_v58, 0.0  ;;  %v573_v28 = vpack.c.bf16 %v554_v21, %v553_v24  ;;  %v731_v55 = vld [vmem:[%s2352_s17 + $0xe8] sm:$0xff]  ;;  %v2104_v58 = vld [vmem:[%s3180_s3 + $0x10] sm:$0xff]   ;;  %v736_v21 = vpack.c.bf16 %v723_v19, %v722_v17  ;;  %v721_v24 = vld [vmem:[%s2352_s17 + $0x98] sm:$0xff] }
 0x134   : > { %v1843_v60 = vpop.f32.mrf.mxu0  ;;  %v735_v27 = vpack.c.bf16 %v721_v24, %v720_v23  ;;  %v2669_v23 = vld [vmem:[%s3181_s4 + $0x28] sm:$0xff] }
 0x135   : > { %v542_v63 = vadd.f32 %v1843_v60, %v2436_v57  ;;  %v557_v8 = vmax.f32 %v531_v62, 0.0  ;;  %v860_v60 = vsel %vm399_vm0, %v741_v44, 0  ;;  %v740_v62 = vpack.c.bf16 %v731_v55, %v730_v54  ;;  %v2617_v54 = vld [vmem:[%s3181_s4 + $0x8] sm:$0xff] }
 0x136   : > { %v533_v1 = vpop.f32.mrf.mxu0  ;;  %v845_v26 = vsel %vm399_vm0, %v736_v21, 0  ;;  %v842_v31 = vsel %vm399_vm0, %v735_v27, 0 }
 0x137   : > { %v560_v4 = vmax.f32 %v542_v63, 0.0  ;;  %v534_v5 = vadd.f32 %v533_v1, %v2447_v61  ;;  %v728_v63 = vld [vmem:[%s2352_s17 + $0xd0] sm:$0xff]  ;;  %v729_v1 = vld [vmem:[%s2352_s17 + $0xd8] sm:$0xff] }
 0x139   : > { %v558_v9 = vmax.f32 %v534_v5, 0.0  ;;  %v576_v10 = vpack.c.bf16 %v560_v4, %v559_v3  ;;  %v2106_v3 = vld [vmem:[%s3178_s1] sm:$0xff]   ;;  %v857_v4 = vsel %vm399_vm0, %v740_v62, 0  ;;  %v739_v5 = vpack.c.bf16 %v729_v1, %v728_v63  ;;  %v2630_v1 = vld [vmem:[%s3182_s5 + $0x8] sm:$0xff] }
 0x13b   : > { %v575_v14 = vpack.c.bf16 %v558_v9, %v557_v8  ;;  %1844 = vmatprep.subr.bf16.mxu1 %v576_v10  ;;  %v727_v8 = vld [vmem:[%s2352_s17 + $0xc8] sm:$0xff]  ;;  %v854_v9 = vsel %vm399_vm0, %v739_v5, 0 }
 0x13c   : > { %1845 = vmatpush3.bf16.msra.mxu1 %v576_v10  ;;  %v738_v10 = vpack.c.bf16 %v727_v8, %v726_v7  ;;  %v2645_v8 = vld [vmem:[%s3182_s5 + $0x10] sm:$0xff] }
 0x13d   : > { %1846 = vmatprep.subr.bf16.mxu1 %v575_v14 }
 0x140   : > { %1847 = vmatpush3.bf16.msra.mxu1 %v575_v14  ;;  %v851_v14 = vsel %vm399_vm0, %v738_v10, 0 }
 0x141   : > { %1848 = vmatprep.subr.bf16.mxu1 %v574_v20 }
 0x144   : > { %1849 = vmatpush3.bf16.msra.mxu1 %v574_v20  ;;  %v848_v20 = vsel %vm399_vm0, %v737_v16, 0 }
 0x145   : > { %1850 = vmatprep.subr.bf16.mxu1 %v573_v28 }
 0x148   : > { %1851 = vmatpush3.bf16.msra.mxu1 %v573_v28  ;;  %v718_v28 = vld [vmem:[%s2352_s17 + $0x80] sm:$0xff]  ;;  %s1135_s17 = ssub.s32 (%p2340_p4), 3, %s1724_s28 }
 0x149   : > { %1852 = vmatprep.subr.bf16.mxu1 %v572_v34  ;;  %v734_v33 = vpack.c.bf16 %v719_v30, %v718_v28  ;;  %p1136_p8 = scmp.lt.s32.totalorder (%p2340_p4), %s1135_s17, 2 }
 0x14c   : > { %1853 = vmatpush3.bf16.msra.mxu1 %v572_v34  ;;  %v839_v34 = vsel %vm399_vm0, %v734_v33, 0 }
 0x14d   : > { %1854 = vmatprep.subr.bf16.mxu1 %v571_v45 }
 0x150   : > { %1855 = vmatpush3.bf16.msra.mxu1 %v571_v45  ;;  %v2112_v45 = vld [vmem:[%s3178_s1 + $0x30] sm:$0xff]  }
 0x151   : > { %1856 = vmatprep.subr.bf16.mxu1 %v570_v47 }
 0x154   : > { %1857 = vmatpush3.bf16.msra.mxu1 %v570_v47  ;;  %v2598_v47 = vld [vmem:[%s3181_s4] sm:$0xff] }
 0x155   : > { %1858 = vmatprep.subr.bf16.mxu1 %v569_v52 }
 0x158   : > { %1859 = vmatpush3.bf16.msra.mxu1 %v569_v52  ;;  %v2612_v52 = vld [vmem:[%s3181_s4 + $0x18] sm:$0xff] }
 0x159   : > { %1932 = vmatprep.subr.msk.bf16.mxu1 %vm399_vm0, %v741_v44 }
 0x15b   : > { %1861 = vmatmul.mubr.bf16.vlgmr.msra.gmra.mxu1 %v2103_v42 }
 0x15c   : > { %1869 = vmatpush3.bf16.xpose.msra.mxu1 %v860_v60  ;;  %1864 = vmatprep.mubr.bf16.mxu1 %v2104_v58 }
 0x15d   : > { %1933 = vmatprep.subr.msk.bf16.mxu1 %vm399_vm0, %v740_v62  ;;  %v2624_v62 = vld [vmem:[%s3182_s5] sm:$0xff] }
 0x163   : > { %1865 = vmatmul.mubr.bf16.gmra.mxu1 %v2105_v2  ;;  %v2635_v2 = vld [vmem:[%s3181_s4 + $0x30] sm:$0xff] }
 0x164   : > { %1871 = vmatpush3.bf16.xpose.msra.mxu1 %v857_v4  ;;  %1884 = vmatprep.mubr.msk.bf16.mxu1 %vm399_vm0, %v2106_v3  ;;  %v2640_v4 = vld [vmem:[%s3181_s4 + $0x20] sm:$0xff] }
 0x165   : > { %1934 = vmatprep.subr.msk.bf16.mxu1 %vm399_vm0, %v739_v5 }
 0x16c   : > { %1873 = vmatpush3.bf16.xpose.msra.mxu1 %v854_v9 }
 0x16d   : > { %1935 = vmatprep.subr.msk.bf16.mxu1 %vm399_vm0, %v738_v10 }
 0x174   : > { %1875 = vmatpush3.bf16.xpose.msra.mxu1 %v851_v14  ;;  %v2656_v14 = vld [vmem:[%s3182_s5 + $0x18] sm:$0xff] }
 0x175   : > { %1936 = vmatprep.subr.msk.bf16.mxu1 %vm399_vm0, %v737_v16 }
 0x17c   : > { %1877 = vmatpush3.bf16.xpose.msra.mxu1 %v848_v20  ;;  %v2664_v20 = vld [vmem:[%s3182_s5 + $0x20] sm:$0xff] }
 0x17d   : > { %1937 = vmatprep.subr.msk.bf16.mxu1 %vm399_vm0, %v736_v21 }
 0x184   : > { %1879 = vmatpush3.bf16.xpose.msra.mxu1 %v845_v26 }
 0x185   : > { %1938 = vmatprep.subr.msk.bf16.mxu1 %vm399_vm0, %v735_v27 }
 0x18c   : > { %1881 = vmatpush3.bf16.xpose.msra.mxu1 %v842_v31 }
 0x18d   : > { %1939 = vmatprep.subr.msk.bf16.mxu1 %vm399_vm0, %v734_v33 }
 0x194   : > { %1883 = vmatpush3.bf16.xpose.msra.mxu1 %v839_v34 }
 0x19b   : > { %1885 = vmatmul.mubr.msk.bf16.vlgmr.msra.gmra.mxu1 %vm399_vm0, %v2107_v35 }
 0x19c   : > { %1888 = vmatprep.mubr.msk.bf16.mxu1 %vm399_vm0, %v2108_v37 }
 0x1a3   : > { %1889 = vmatmul.mubr.msk.bf16.gmra.mxu1 %vm399_vm0, %v2109_v38  ;;  %v2679_v38 = vld [vmem:[%s3182_s5 + $0x30] sm:$0xff] }
 0x1a4   : > { %1892 = vmatprep.mubr.msk.bf16.mxu1 %vm399_vm0, %v2110_v40  ;;  %v2684_v40 = vld [vmem:[%s3182_s5 + $0x28] sm:$0xff] }
 0x1ab   : > { %1893 = vmatmul.mubr.msk.bf16.gmra.mxu1 %vm399_vm0, %v2111_v43 }
 0x1ac   : > { %1896 = vmatprep.mubr.msk.bf16.mxu1 %vm399_vm0, %v2112_v45 }
 0x1b3   : > { %1897 = vmatmul.mubr.msk.bf16.gmra.mxu1 %vm399_vm0, %v2113_v46 }
 0x21b   : > { %v1862_v41 = vpop.f32.mrf.mxu1 }
 0x21c   : > { %v652_v55 = vadd.f32 %v1862_v41, %v2606_v49  ;;  %v2689_v41 = vld [vmem:[%s3182_s5 + $0x38] sm:$0xff] }
 0x21d   : > { %v643_v50 = vpop.f32.mrf.mxu1 }
 0x21e   : > { %v644_v51 = vadd.f32 %v643_v50, %v2598_v47  ;;  %v676_v5 = vmax.f32 %v652_v55, 0.0 }
 0x21f   : > { %v1863_v44 = vpop.f32.mrf.mxu1 }
 0x220   : > { %v655_v42 = vadd.f32 %v1863_v44, %v2612_v52  ;;  %v674_v60 = vmax.f32 %v644_v51, 0.0  ;;  %v692_v24 = vmul.f32 %v2645_v8, %v676_v5 }
 0x221   : > { %v646_v58 = vpop.f32.mrf.mxu1 }
 0x222   : > { %v647_v63 = vadd.f32 %v646_v58, %v2617_v54  ;;  %v677_v9 = vmax.f32 %v655_v42, 0.0  ;;  %v690_v13 = vmul.f32 %v2624_v62, %v674_v60 }
 0x223   : > { %v1866_v3 = vpop.f32.mrf.mxu1 }
 0x224   : > { %v675_v7 = vmax.f32 %v647_v63, 0.0  ;;  %v668_v17 = vadd.f32 %v1866_v3, %v2635_v2  ;;  %v693_v30 = vmul.f32 %v2656_v14, %v677_v9 }
 0x225   : > { %v659_v10 = vpop.f32.mrf.mxu1 }
 0x226   : > { %v691_v16 = vmul.f32 %v2630_v1, %v675_v7  ;;  %v660_v19 = vadd.f32 %v659_v10, %v2640_v4  ;;  %v680_v34 = vmax.f32 %v668_v17, 0.0  ;;  %v713_v7 = vlaneseq }
 0x227   : > { %v1867_v21 = vpop.f32.mrf.mxu1  ;;  %v711_v10 = vstv %s2694_s16 }
 0x228   : > { %v698_v26 = vadd.f32 %v691_v16, %v690_v13  ;;  %v678_v27 = vmax.f32 %v660_v19, 0.0  ;;  %v671_v28 = vadd.f32 %v1867_v21, %v2650_v12  ;;  %v696_v48 = vmul.f32 %v2679_v38, %v680_v34 }
 0x229   : > { %v662_v31 = vpop.f32.mrf.mxu1  ;;  %vm2698_vm1 = vcmp.lt.s32.totalorder %v713_v7, 128 }
 0x22a   : > { %v699_v33 = vadd.f32 %v698_v26, %v692_v24  ;;  %v694_v35 = vmul.f32 %v2664_v20, %v678_v27  ;;  %v663_v37 = vadd.f32 %v662_v31, %v2669_v23  ;;  %v681_v45 = vmax.f32 %v671_v28, 0.0 }
 0x22c   : > { %v700_v43 = vadd.f32 %v699_v33, %v693_v30  ;;  %v679_v46 = vmax.f32 %v663_v37, 0.0  ;;  %v697_v44 = vmul.f32 %v2689_v41, %v681_v45 }
 0x22e   : > { %v701_v50 = vadd.f32 %v700_v43, %v694_v35  ;;  %v695_v51 = vmul.f32 %v2684_v40, %v679_v46 }
 0x230   : > { %v702_v55 = vadd.f32 %v701_v50, %v695_v51 }
 0x232   : > { %v703_v42 = vadd.f32 %v702_v55, %v696_v48 }
 0x234   : > { %v704_v58 = vadd.f32 %v703_v42, %v697_v44 }
 0x236   : > { %v705_v60 = vrot.slane %v704_v58, 4 }
 0x238   : > { %v706_v63 = vadd.f32 %v705_v60, %v704_v58 }
 0x23a   : > { %v707_v3 = vrot.slane %v706_v63, 2 }
 0x23c   : > { %v708_v5 = vadd.f32 %v707_v3, %v706_v63 }
 0x23e   : > { %v709_v9 = vrot.slane %v708_v5, 1 }
 0x240   : > { %v710_v13 = vadd.f32 %v709_v9, %v708_v5 }
 0x242   : > { %v712_v17 = vadd.f32 %v711_v10, %v710_v13 }
 0x244   : > { %717 = vst.msk [vmem:[%s2704_s20] sm:$0x1] %vm2698_vm1, %v712_v17 }
 0x25b   : > { %v1886_v19 = vpop.f32.mrf.mxu1 }
 0x25d   : > { %v896_v21 = vpop.f32.mrf.mxu1 }
 0x25f   : > { %v1887_v24 = vpop.f32.mrf.mxu1 }
 0x261   : > { %v899_v26 = vpop.f32.mrf.mxu1 }
 0x263   : > { %v1890_v27 = vpop.f32.mrf.mxu1 }
 0x265   : > { %v912_v28 = vpop.f32.mrf.mxu1 }
 0x267   : > { %v1891_v30 = vpop.f32.mrf.mxu1 }
 0x269   : > { %v915_v31 = vpop.f32.mrf.mxu1 }
 0x26b   : > { %v1894_v33 = vpop.f32.mrf.mxu1 }
 0x26c   : > { %v937_v63 = vadd.f32 %v1894_v33, %v2454_v0 }
 0x26d   : > { %v928_v34 = vpop.f32.mrf.mxu1 }
 0x26f   : > { %v1895_v35 = vpop.f32.mrf.mxu1 }
 0x270   : > { %v940_v55 = vadd.f32 %v1895_v35, %v2442_v59  ;;  %v924_v59 = vadd.f32 %v1891_v30, %v2473_v15  ;;  %v905_v30 = vadd.f32 %v1886_v19, %v2503_v32  ;;  %v2115_v32 = vld [vmem:[%s3180_s3 + $0x8] sm:$0xff]  }
 0x271   : > { %v931_v37 = vpop.f32.mrf.mxu1 }
 0x272   : > { %v970_v9 = vmax.f32 %v940_v55, 0.0  ;;  %v966_v33 = vmax.f32 %v924_v59, 0.0 }
 0x273   : > { %v1898_v43 = vpop.f32.mrf.mxu1 }
 0x274   : > { %v953_v46 = vadd.f32 %v1898_v43, %v2426_v53  ;;  %v932_v53 = vadd.f32 %v931_v37, %v2461_v6  ;;  %v916_v43 = vadd.f32 %v915_v31, %v2485_v22  ;;  %v961_v22 = vmax.f32 %v905_v30, 0.0 }
 0x275   : > { %v944_v45 = vpop.f32.mrf.mxu1  ;;  %v897_v31 = vadd.f32 %v896_v21, %v2516_v39  ;;  %v2117_v39 = vld [vmem:[%s3180_s3 + $0x18] sm:$0xff]  }
 0x276   : > { %v945_v50 = vadd.f32 %v944_v45, %v2431_v56  ;;  %v973_v42 = vmax.f32 %v953_v46, 0.0  ;;  %v969_v56 = vmax.f32 %v937_v63, 0.0  ;;  %v968_v35 = vmax.f32 %v932_v53, 0.0 }
 0x277   : > { %v1899_v48 = vpop.f32.mrf.mxu1  ;;  %v913_v45 = vadd.f32 %v912_v28, %v2491_v25  ;;  %v964_v15 = vmax.f32 %v916_v43, 0.0 }
 0x278   : > { %v956_v51 = vadd.f32 %v1899_v48, %v2436_v57  ;;  %v971_v3 = vmax.f32 %v945_v50, 0.0  ;;  %v929_v57 = vadd.f32 %v928_v34, %v2467_v11  ;;  %v988_v17 = vpack.c.bf16 %v970_v9, %v969_v56 }
 0x279   : > { %v947_v44 = vpop.f32.mrf.mxu1  ;;  %v908_v11 = vadd.f32 %v1887_v24, %v2497_v29  ;;  %v963_v46 = vmax.f32 %v913_v45, 0.0  ;;  %v959_v29 = vmax.f32 %v897_v31, 0.0 }
 0x27a   : > { %v974_v58 = vmax.f32 %v956_v51, 0.0  ;;  %v948_v60 = vadd.f32 %v947_v44, %v2447_v61  ;;  %v921_v61 = vadd.f32 %v1890_v27, %v2479_v18  ;;  %v967_v0 = vmax.f32 %v929_v57, 0.0 }
 0x27b   : > { %v962_v18 = vmax.f32 %v908_v11, 0.0  ;;  %v900_v27 = vadd.f32 %v899_v26, %v2509_v36  ;;  %v985_v48 = vpack.c.bf16 %v964_v15, %v963_v46  ;;  %v2116_v36 = vld [vmem:[%s3180_s3 + $0x10] sm:$0xff]  }
 0x27c   : > { %v990_v5 = vpack.c.bf16 %v974_v58, %v973_v42  ;;  %v972_v7 = vmax.f32 %v948_v60, 0.0  ;;  %v987_v6 = vpack.c.bf16 %v968_v35, %v967_v0  ;;  %v965_v37 = vmax.f32 %v921_v61, 0.0 }
 0x27d   : > { %v984_v25 = vpack.c.bf16 %v962_v18, %v961_v22  ;;  %v960_v28 = vmax.f32 %v900_v27, 0.0 }
 0x27e   : > { %v989_v13 = vpack.c.bf16 %v972_v7, %v971_v3  ;;  %1900 = vmatprep.subr.bf16.mxu0 %v990_v5  ;;  %v986_v34 = vpack.c.bf16 %v966_v33, %v965_v37 }
 0x27f   : > { %1901 = vmatpush3.bf16.msra.mxu0 %v990_v5  ;;  %v983_v24 = vpack.c.bf16 %v960_v28, %v959_v29 }
 0x280   : > { %1902 = vmatprep.subr.bf16.mxu0 %v989_v13 }
 0x283   : > { %1903 = vmatpush3.bf16.msra.mxu0 %v989_v13 }
 0x284   : > { %1904 = vmatprep.subr.bf16.mxu0 %v988_v17 }
 0x287   : > { %1905 = vmatpush3.bf16.msra.mxu0 %v988_v17 }
 0x288   : > { %1906 = vmatprep.subr.bf16.mxu0 %v987_v6 }
 0x28b   : > { %1907 = vmatpush3.bf16.msra.mxu0 %v987_v6 }
 0x28c   : > { %1908 = vmatprep.subr.bf16.mxu0 %v986_v34 }
 0x28f   : > { %1909 = vmatpush3.bf16.msra.mxu0 %v986_v34 }
 0x290   : > { %1910 = vmatprep.subr.bf16.mxu0 %v985_v48 }
 0x293   : > { %1911 = vmatpush3.bf16.msra.mxu0 %v985_v48 }
 0x294   : > { %1912 = vmatprep.subr.bf16.mxu0 %v984_v25 }
 0x297   : > { %1913 = vmatpush3.bf16.msra.mxu0 %v984_v25 }
 0x298   : > { %1914 = vmatprep.subr.bf16.mxu0 %v983_v24 }
 0x29b   : > { %1915 = vmatpush3.bf16.msra.mxu0 %v983_v24 }
 0x29e   : > { %1917 = vmatmul.mubr.bf16.vlgmr.msra.gmra.mxu0 %v2115_v32 }
 0x29f   : > { %1920 = vmatprep.mubr.bf16.mxu0 %v2116_v36 }
 0x2a6   : > { %1921 = vmatmul.mubr.bf16.gmra.mxu0 %v2117_v39 }
 0x35e   : > { %v1918_v19 = vpop.f32.mrf.mxu0 }
 0x35f   : > { %v1066_v51 = vadd.f32 %v1918_v19, %v2606_v49 }
 0x360   : > { %v1057_v21 = vpop.f32.mrf.mxu0 }
 0x361   : > { %v1058_v26 = vadd.f32 %v1057_v21, %v2598_v47  ;;  %v1090_v63 = vmax.f32 %v1066_v51, 0.0 }
 0x362   : > { %v1919_v50 = vpop.f32.mrf.mxu0 }
 0x363   : > { %v1088_v55 = vmax.f32 %v1058_v26, 0.0  ;;  %v1069_v42 = vadd.f32 %v1919_v50, %v2612_v52  ;;  %v1106_v49 = vmul.f32 %v1090_v63, %v2645_v8 }
 0x364   : > { %v1060_v44 = vpop.f32.mrf.mxu0 }
 0x365   : > { %v1061_v58 = vadd.f32 %v1060_v44, %v2617_v54  ;;  %v1104_v7 = vmul.f32 %v1088_v55, %v2624_v62  ;;  %v1091_v9 = vmax.f32 %v1069_v42, 0.0 }
 0x366   : > { %v1922_v60 = vpop.f32.mrf.mxu0 }
 0x367   : > { %v1089_v3 = vmax.f32 %v1061_v58, 0.0  ;;  %v1082_v57 = vadd.f32 %v1922_v60, %v2635_v2  ;;  %v1107_v54 = vmul.f32 %v1091_v9, %v2656_v14 }
 0x368   : > { %v1073_v5 = vpop.f32.mrf.mxu0 }
 0x369   : > { %v1105_v53 = vmul.f32 %v1089_v3, %v2630_v1  ;;  %v1074_v47 = vadd.f32 %v1073_v5, %v2640_v4  ;;  %v1094_v61 = vmax.f32 %v1082_v57, 0.0 }
 0x36a   : > { %v1923_v13 = vpop.f32.mrf.mxu0 }
 0x36b   : > { %v1112_v56 = vadd.f32 %v1105_v53, %v1104_v7  ;;  %v1092_v52 = vmax.f32 %v1074_v47, 0.0  ;;  %v1085_v35 = vadd.f32 %v1923_v13, %v2650_v12  ;;  %v1110_v43 = vmul.f32 %v1094_v61, %v2679_v38 }
 0x36c   : > { %v1076_v59 = vpop.f32.mrf.mxu0 }
 0x36d   : > { %v1113_v17 = vadd.f32 %v1112_v56, %v1106_v49  ;;  %v1077_v62 = vadd.f32 %v1076_v59, %v2669_v23  ;;  %v1108_v1 = vmul.f32 %v1092_v52, %v2664_v20  ;;  %v1095_v33 = vmax.f32 %v1085_v35, 0.0 }
 0x36f   : > { %v1114_v0 = vadd.f32 %v1113_v17, %v1107_v54  ;;  %v1093_v4 = vmax.f32 %v1077_v62, 0.0  ;;  %v1111_v14 = vmul.f32 %v1095_v33, %v2689_v41 }
 0x371   : > { %v1115_v8 = vadd.f32 %v1114_v0, %v1108_v1  ;;  %v1109_v2 = vmul.f32 %v1093_v4, %v2684_v40 }
 0x373   : > { %v1116_v6 = vadd.f32 %v1115_v8, %v1109_v2 }
 0x375   : > { %v1117_v37 = vadd.f32 %v1116_v6, %v1110_v43 }
 0x377   : > { %v1118_v12 = vadd.f32 %v1117_v37, %v1111_v14 }
 0x379   : > { %v1119_v45 = vrot.slane %v1118_v12, 4 }
 0x37b   : > { %v1120_v23 = vadd.f32 %v1119_v45, %v1118_v12 }
 0x37d   : > { %v1121_v11 = vrot.slane %v1120_v23, 2 }
 0x37f   : > { %v1122_v34 = vadd.f32 %v1121_v11, %v1120_v23 }
 0x381   : > { %v1123_v20 = vrot.slane %v1122_v34, 1 }
 0x383   : > { %v1124_v15 = vadd.f32 %v1123_v20, %v1122_v34  ;;  %1133 = sbr.rel (!%p2340_p4) target bundleno = 1050 (0x41a), region = 52 }
 0x385   : > { %v1125_v30 = vadd.f32 %v1124_v15, %v711_v10 }
 0x387   : > { %1126 = vst.msk [vmem:[%s2704_s20 + $0x1] sm:$0x1] %vm2698_vm1, %v1125_v30 }
 0x388   : > { %s3204_s17 = smov (!%p1136_p8, %s1135_s17), 2 }
 0x389   : > { %s1725_s12 = sshll.u32 %s3204_s17, 4 }
 0x38a   : > { %p1727_p9 = scmp.eq.s32.totalorder %s1725_s12, 0 }
 0x38b   : > { %p1144_p10 = scmp.lt.u32.totalorder (!%p1727_p9), %s3204_s17, 8 }
 0x38c   : > { %1143 = sbr.rel (%p1727_p9) target bundleno = 1050 (0x41a), region = 56 }
 0x391   : > { %1147 = sbr.rel (%p1144_p10) target bundleno = 1041 (0x411), region = 60  ;;  %s2768_s10 = sand.u32 (!%p1144_p10), 7, %s3204_s17  }
 0x392   : > { %p1164_p11 = scmp.eq.s32.totalorder (!%p1144_p10), %s2768_s10, 0  ;;  %p1728_p12 = scmp.ne.s32.totalorder (!%p1144_p10), %s2768_s10, 0 }
 0x396   : > { %1167 = sbr.rel (%p1728_p12) target bundleno = 977 (0x3d1), region = 75  ;;  %s1168_s6 = sshrl.u32 (!%p1728_p12), %s3204_s17, 3 }
 0x397   : > { %s2775_s13 = sshrl.u32 (!%p1728_p12), %s1168_s6, 6 }
 0x398   : > { %p1729_p13 = scmp.le.s32.totalorder (!%p1728_p12), %s2775_s13, 0 }
 0x39b   : > { %1604 = sbr.rel (%p1729_p13) target bundleno = 961 (0x3c1), region = 156  ;;  %s3188_s14 = smov (!%p1729_p13), %s2761_s11 }
 0x39c   : > { %s3189_s15 = smov (!%p1729_p13), %s2704_s20  ;;  %s2784_s16 = smov (!%p1729_p13), 0  }
 0x39d   : > { %s2786_s18 = smov (!%p1729_p13), 0  }
 0x3a0 LB: >> { %v1181_v38 = vld [vmem:[%s2212_s15] sm:$0xff]  ;;  %v1183_v40 = vld [vmem:[%s2212_s15 + $0x8] sm:$0xff]  ;;  %v1185_v41 = vld [vmem:[%s2212_s15 + $0x10] sm:$0xff]  ;;  %s1309_s19 = sadd.s32 1, %s2216_s16  ;;  %s1175_s18 = sadd.s32 1, %s2220_s18   ;;  %s2220_s18 = sphi %s2786_s18, %s1175_s18   ;;  %s2216_s16 = sphi %s2784_s16, %s3192_s16   ;;  %s2212_s15 = sphi %s3189_s15, %s3191_s15   ;;  %s2208_s14 = sphi %s3188_s14, %s3190_s14  }
 0x3a1   : >> { %1182 = vst [vmem:[%s2208_s14] sm:$0xff] %v1181_v38  ;;  %1184 = vst [vmem:[%s2208_s14 + $0x8] sm:$0xff] %v1183_v40  ;;  %v1187_v10 = vld [vmem:[%s2212_s15 + $0x18] sm:$0xff]  ;;  %v1189_v16 = vld [vmem:[%s2212_s15 + $0x20] sm:$0xff]  ;;  %p1310_p0 = scmp.ge.s32.totalorder %s1309_s19, %s2775_s13  ;;  %p1174_p1 = scmp.ge.s32.totalorder %s1175_s18, %s2775_s13 }
 0x3a2   : >> { %1186 = vst [vmem:[%s2208_s14 + $0x10] sm:$0xff] %v1185_v41  ;;  %v1191_v46 = vld [vmem:[%s2212_s15 + $0x28] sm:$0xff]  ;;  %1188 = vst [vmem:[%s2208_s14 + $0x18] sm:$0xff] %v1187_v10  ;;  %v1193_v18 = vld [vmem:[%s2212_s15 + $0x30] sm:$0xff] }
 0x3a3   : >> { %1190 = vst [vmem:[%s2208_s14 + $0x20] sm:$0xff] %v1189_v16  ;;  %1192 = vst [vmem:[%s2208_s14 + $0x28] sm:$0xff] %v1191_v46  ;;  %v1195_v27 = vld [vmem:[%s2212_s15 + $0x38] sm:$0xff]  ;;  %v1197_v48 = vld [vmem:[%s2212_s15 + $0x40] sm:$0xff]  ;;  %s3206_s19 = smov (%p1310_p0, %s1309_s19), 0 }
 0x3a4   : >> { %1194 = vst [vmem:[%s2208_s14 + $0x30] sm:$0xff] %v1193_v18  ;;  %1196 = vst [vmem:[%s2208_s14 + $0x38] sm:$0xff] %v1195_v27  ;;  %v1199_v22 = vld [vmem:[%s2212_s15 + $0x48] sm:$0xff]  ;;  %v1201_v31 = vld [vmem:[%s2212_s15 + $0x50] sm:$0xff]  ;;  %s1730_s26 = sshll.u32 %s3206_s19, 9  ;;  %s3192_s16 = smov %s3206_s19 }
 0x3a5   : >> { %1198 = vst [vmem:[%s2208_s14 + $0x40] sm:$0xff] %v1197_v48  ;;  %v1203_v25 = vld [vmem:[%s2212_s15 + $0x58] sm:$0xff]  ;;  %1200 = vst [vmem:[%s2208_s14 + $0x48] sm:$0xff] %v1199_v22  ;;  %v1205_v28 = vld [vmem:[%s2212_s15 + $0x60] sm:$0xff]  ;;  %s2842_s21 = scalar_lea.vmem %s2704_s20, %s1730_s26 [#allocation3]   ;;  %s2845_s22 = scalar_lea.vmem %s2761_s11, %s1730_s26  }
 0x3a6   : >> { %1202 = vst [vmem:[%s2208_s14 + $0x50] sm:$0xff] %v1201_v31  ;;  %1204 = vst [vmem:[%s2208_s14 + $0x58] sm:$0xff] %v1203_v25  ;;  %v1207_v29 = vld [vmem:[%s2212_s15 + $0x68] sm:$0xff]  ;;  %v1209_v24 = vld [vmem:[%s2212_s15 + $0x70] sm:$0xff] }
 0x3a7   : >> { %1206 = vst [vmem:[%s2208_s14 + $0x60] sm:$0xff] %v1205_v28  ;;  %1208 = vst [vmem:[%s2208_s14 + $0x68] sm:$0xff] %v1207_v29  ;;  %v1211_v32 = vld [vmem:[%s2212_s15 + $0x78] sm:$0xff]  ;;  %v1213_v36 = vld [vmem:[%s2212_s15 + $0x80] sm:$0xff] }
 0x3a8   : >> { %1210 = vst [vmem:[%s2208_s14 + $0x70] sm:$0xff] %v1209_v24  ;;  %v1215_v39 = vld [vmem:[%s2212_s15 + $0x88] sm:$0xff]  ;;  %1212 = vst [vmem:[%s2208_s14 + $0x78] sm:$0xff] %v1211_v32  ;;  %v1217_v19 = vld [vmem:[%s2212_s15 + $0x90] sm:$0xff] }
 0x3a9   : >> { %1214 = vst [vmem:[%s2208_s14 + $0x80] sm:$0xff] %v1213_v36  ;;  %1216 = vst [vmem:[%s2208_s14 + $0x88] sm:$0xff] %v1215_v39  ;;  %v1219_v21 = vld [vmem:[%s2212_s15 + $0x98] sm:$0xff]  ;;  %v1221_v26 = vld [vmem:[%s2212_s15 + $0xa0] sm:$0xff] }
 0x3aa   : >> { %1218 = vst [vmem:[%s2208_s14 + $0x90] sm:$0xff] %v1217_v19  ;;  %1220 = vst [vmem:[%s2208_s14 + $0x98] sm:$0xff] %v1219_v21  ;;  %v1223_v50 = vld [vmem:[%s2212_s15 + $0xa8] sm:$0xff]  ;;  %v1225_v51 = vld [vmem:[%s2212_s15 + $0xb0] sm:$0xff] }
 0x3ab   : >> { %1222 = vst [vmem:[%s2208_s14 + $0xa0] sm:$0xff] %v1221_v26  ;;  %v1227_v44 = vld [vmem:[%s2212_s15 + $0xb8] sm:$0xff]  ;;  %1224 = vst [vmem:[%s2208_s14 + $0xa8] sm:$0xff] %v1223_v50  ;;  %v1229_v55 = vld [vmem:[%s2212_s15 + $0xc0] sm:$0xff] }
 0x3ac   : >> { %1226 = vst [vmem:[%s2208_s14 + $0xb0] sm:$0xff] %v1225_v51  ;;  %1228 = vst [vmem:[%s2208_s14 + $0xb8] sm:$0xff] %v1227_v44  ;;  %v1231_v42 = vld [vmem:[%s2212_s15 + $0xc8] sm:$0xff]  ;;  %v1233_v58 = vld [vmem:[%s2212_s15 + $0xd0] sm:$0xff] }
 0x3ad   : >> { %1230 = vst [vmem:[%s2208_s14 + $0xc0] sm:$0xff] %v1229_v55  ;;  %1232 = vst [vmem:[%s2208_s14 + $0xc8] sm:$0xff] %v1231_v42  ;;  %v1235_v60 = vld [vmem:[%s2212_s15 + $0xd8] sm:$0xff]  ;;  %v1237_v63 = vld [vmem:[%s2212_s15 + $0xe0] sm:$0xff] }
 0x3ae   : >> { %1234 = vst [vmem:[%s2208_s14 + $0xd0] sm:$0xff] %v1233_v58  ;;  %v1239_v3 = vld [vmem:[%s2212_s15 + $0xe8] sm:$0xff]  ;;  %1236 = vst [vmem:[%s2208_s14 + $0xd8] sm:$0xff] %v1235_v60  ;;  %v1241_v5 = vld [vmem:[%s2212_s15 + $0xf0] sm:$0xff] }
 0x3af   : >> { %1238 = vst [vmem:[%s2208_s14 + $0xe0] sm:$0xff] %v1237_v63  ;;  %1240 = vst [vmem:[%s2208_s14 + $0xe8] sm:$0xff] %v1239_v3  ;;  %v1243_v7 = vld [vmem:[%s2212_s15 + $0xf8] sm:$0xff]  ;;  %v1245_v9 = vld [vmem:[%s2212_s15 + $0x100] sm:$0xff] }
 0x3b0   : >> { %1242 = vst [vmem:[%s2208_s14 + $0xf0] sm:$0xff] %v1241_v5  ;;  %1244 = vst [vmem:[%s2208_s14 + $0xf8] sm:$0xff] %v1243_v7  ;;  %v1247_v53 = vld [vmem:[%s2212_s15 + $0x108] sm:$0xff]  ;;  %v1249_v47 = vld [vmem:[%s2212_s15 + $0x110] sm:$0xff] }
 0x3b1   : >> { %1246 = vst [vmem:[%s2208_s14 + $0x100] sm:$0xff] %v1245_v9  ;;  %v1251_v13 = vld [vmem:[%s2212_s15 + $0x118] sm:$0xff]  ;;  %1248 = vst [vmem:[%s2208_s14 + $0x108] sm:$0xff] %v1247_v53  ;;  %v1253_v49 = vld [vmem:[%s2212_s15 + $0x120] sm:$0xff] }
 0x3b2   : >> { %1250 = vst [vmem:[%s2208_s14 + $0x110] sm:$0xff] %v1249_v47  ;;  %1252 = vst [vmem:[%s2208_s14 + $0x118] sm:$0xff] %v1251_v13  ;;  %v1255_v56 = vld [vmem:[%s2212_s15 + $0x128] sm:$0xff]  ;;  %v1257_v57 = vld [vmem:[%s2212_s15 + $0x130] sm:$0xff] }
 0x3b3   : >> { %1254 = vst [vmem:[%s2208_s14 + $0x120] sm:$0xff] %v1253_v49  ;;  %1256 = vst [vmem:[%s2208_s14 + $0x128] sm:$0xff] %v1255_v56  ;;  %v1259_v52 = vld [vmem:[%s2212_s15 + $0x138] sm:$0xff]  ;;  %v1261_v59 = vld [vmem:[%s2212_s15 + $0x140] sm:$0xff] }
 0x3b4   : >> { %1258 = vst [vmem:[%s2208_s14 + $0x130] sm:$0xff] %v1257_v57  ;;  %v1263_v54 = vld [vmem:[%s2212_s15 + $0x148] sm:$0xff]  ;;  %1260 = vst [vmem:[%s2208_s14 + $0x138] sm:$0xff] %v1259_v52  ;;  %v1265_v17 = vld [vmem:[%s2212_s15 + $0x150] sm:$0xff] }
 0x3b5   : >> { %1262 = vst [vmem:[%s2208_s14 + $0x140] sm:$0xff] %v1261_v59  ;;  %1264 = vst [vmem:[%s2208_s14 + $0x148] sm:$0xff] %v1263_v54  ;;  %v1267_v35 = vld [vmem:[%s2212_s15 + $0x158] sm:$0xff]  ;;  %v1269_v62 = vld [vmem:[%s2212_s15 + $0x160] sm:$0xff] }
 0x3b6   : >> { %1266 = vst [vmem:[%s2208_s14 + $0x150] sm:$0xff] %v1265_v17  ;;  %1268 = vst [vmem:[%s2208_s14 + $0x158] sm:$0xff] %v1267_v35  ;;  %v1271_v61 = vld [vmem:[%s2212_s15 + $0x168] sm:$0xff]  ;;  %v1273_v1 = vld [vmem:[%s2212_s15 + $0x170] sm:$0xff] }
 0x3b7   : >> { %1270 = vst [vmem:[%s2208_s14 + $0x160] sm:$0xff] %v1269_v62  ;;  %v1275_v0 = vld [vmem:[%s2212_s15 + $0x178] sm:$0xff]  ;;  %1272 = vst [vmem:[%s2208_s14 + $0x168] sm:$0xff] %v1271_v61  ;;  %v1277_v4 = vld [vmem:[%s2212_s15 + $0x180] sm:$0xff] }
 0x3b8   : >> { %1274 = vst [vmem:[%s2208_s14 + $0x170] sm:$0xff] %v1273_v1  ;;  %1276 = vst [vmem:[%s2208_s14 + $0x178] sm:$0xff] %v1275_v0  ;;  %v1279_v8 = vld [vmem:[%s2212_s15 + $0x188] sm:$0xff]  ;;  %v1281_v33 = vld [vmem:[%s2212_s15 + $0x190] sm:$0xff] }
 0x3b9   : >> { %1278 = vst [vmem:[%s2208_s14 + $0x180] sm:$0xff] %v1277_v4  ;;  %1280 = vst [vmem:[%s2208_s14 + $0x188] sm:$0xff] %v1279_v8  ;;  %v1283_v2 = vld [vmem:[%s2212_s15 + $0x198] sm:$0xff]  ;;  %v1285_v43 = vld [vmem:[%s2212_s15 + $0x1a0] sm:$0xff] }
 0x3ba   : >> { %1282 = vst [vmem:[%s2208_s14 + $0x190] sm:$0xff] %v1281_v33  ;;  %v1287_v6 = vld [vmem:[%s2212_s15 + $0x1a8] sm:$0xff]  ;;  %1284 = vst [vmem:[%s2208_s14 + $0x198] sm:$0xff] %v1283_v2  ;;  %v1289_v14 = vld [vmem:[%s2212_s15 + $0x1b0] sm:$0xff] }
 0x3bb   : >> { %1286 = vst [vmem:[%s2208_s14 + $0x1a0] sm:$0xff] %v1285_v43  ;;  %1288 = vst [vmem:[%s2208_s14 + $0x1a8] sm:$0xff] %v1287_v6  ;;  %v1291_v37 = vld [vmem:[%s2212_s15 + $0x1b8] sm:$0xff]  ;;  %v1293_v12 = vld [vmem:[%s2212_s15 + $0x1c0] sm:$0xff] }
 0x3bc   : >> { %1290 = vst [vmem:[%s2208_s14 + $0x1b0] sm:$0xff] %v1289_v14  ;;  %1292 = vst [vmem:[%s2208_s14 + $0x1b8] sm:$0xff] %v1291_v37  ;;  %v1295_v45 = vld [vmem:[%s2212_s15 + $0x1c8] sm:$0xff]  ;;  %v1297_v23 = vld [vmem:[%s2212_s15 + $0x1d0] sm:$0xff]  ;;  %1177 = sbr.rel (!%p1174_p1) target bundleno = 928 (0x3a0), region = 162 }
 0x3bd   : >> { %1294 = vst [vmem:[%s2208_s14 + $0x1c0] sm:$0xff] %v1293_v12  ;;  %v1299_v11 = vld [vmem:[%s2212_s15 + $0x1d8] sm:$0xff]  ;;  %1296 = vst [vmem:[%s2208_s14 + $0x1c8] sm:$0xff] %v1295_v45  ;;  %v1301_v34 = vld [vmem:[%s2212_s15 + $0x1e0] sm:$0xff] }
 0x3be   : >> { %1298 = vst [vmem:[%s2208_s14 + $0x1d0] sm:$0xff] %v1297_v23  ;;  %1300 = vst [vmem:[%s2208_s14 + $0x1d8] sm:$0xff] %v1299_v11  ;;  %v1303_v20 = vld [vmem:[%s2212_s15 + $0x1e8] sm:$0xff]  ;;  %v1305_v15 = vld [vmem:[%s2212_s15 + $0x1f0] sm:$0xff] }
 0x3bf   : >> { %1302 = vst [vmem:[%s2208_s14 + $0x1e0] sm:$0xff] %v1301_v34  ;;  %1304 = vst [vmem:[%s2208_s14 + $0x1e8] sm:$0xff] %v1303_v20  ;;  %v1307_v30 = vld [vmem:[%s2212_s15 + $0x1f8] sm:$0xff]  ;;  %s3191_s15 = smov %s2842_s21 }
 0x3c0   : >> { %1306 = vst [vmem:[%s2208_s14 + $0x1f0] sm:$0xff] %v1305_v15  ;;  %1308 = vst [vmem:[%s2208_s14 + $0x1f8] sm:$0xff] %v1307_v30  ;;  %s3190_s14 = smov %s2845_s22 }
 0x3c1 PF: > { %s2951_s23 = sand.u32 63, %s1168_s6   ;;  %s1752_s24 = sshll.u32 %s2775_s13, 13 }
 0x3c2   : > { %s1320_s25 = sshra.s32 %s1752_s24, 4  ;;  %p1735_p2 = scmp.le.s32.totalorder %s2951_s23, 0 }
 0x3c3   : > { %s1321_s28 = scalar_lea.vmem %s2704_s20, %s1320_s25 [#allocation3]   ;;  %s1324_s30 = scalar_lea.vmem %s2761_s11, %s1320_s25  }
 0x3c4   : > { %1618 = sbr.rel (%p1735_p2) target bundleno = 977 (0x3d1), region = 167  ;;  %s2222_s8 = smov (!%p1735_p2), %s1324_s30  }
 0x3c5   : > { %s2226_s12 = smov (!%p1735_p2), %s1321_s28   ;;  %s2230_s19 = smov (!%p1735_p2), 0  }
 0x3c6   : > { %s2234_s18 = smov (!%p1735_p2), 0  }
 0x3c9 LB: >> { %v1336_v38 = vld [vmem:[%s2228_s12] sm:$0xff]  ;;  %s1338_s6 = sadd.s32 1, %s2232_s19  ;;  %s1330_s18 = sadd.s32 1, %s2236_s18   ;;  %s2236_s18 = sphi %s2234_s18, %s1330_s18   ;;  %s2232_s19 = sphi %s2230_s19, %s2231_s19   ;;  %s2228_s12 = sphi %s2226_s12, %s1343_s12   ;;  %s2224_s8 = sphi %s2222_s8, %s1344_s8  }
 0x3ca   : >> { %1337 = vst [vmem:[%s2224_s8] sm:$0xff] %v1336_v38  ;;  %p1339_p3 = scmp.ge.s32.totalorder %s1338_s6, %s2951_s23  ;;  %p1329_p4 = scmp.ge.s32.totalorder %s1330_s18, %s2951_s23 }
 0x3cc   : >> { %s3208_s6 = smov (%p1339_p3, %s1338_s6), 0  ;;  %1332 = sbr.rel (!%p1329_p4) target bundleno = 969 (0x3c9), region = 173 }
 0x3cd   : >> { %s1736_s13 = sshll.u32 %s3208_s6, 3  ;;  %s2231_s19 = smov %s3208_s6  }
 0x3ce   : >> { %s1343_s12 = scalar_lea.vmem %s1321_s28, %s1736_s13 [#allocation3]   ;;  %s1344_s8 = scalar_lea.vmem %s1324_s30, %s1736_s13  }
 0x3d1 PF: > { %1347 = sbr.rel (%p1164_p11) target bundleno = 1041 (0x411), region = 93  ;;  %s2963_s14 = ssub.s32 (!%p1164_p11), %s3204_s17, %s2768_s10 }
 0x3d2   : > { %s1353_s15 = sshrl.u32 (!%p1164_p11), %s3204_s17, 3  ;;  %s1350_s16 = scalar_lea.vmem (!%p1164_p11), %s2704_s20, %s2963_s14 [#allocation3] }
 0x3d3   : > { %s1352_s26 = scalar_lea.vmem (!%p1164_p11), %s2761_s11, %s2963_s14  ;;  %s2972_s21 = sshrl.u32 (!%p1164_p11), %s1353_s15, 6 }
 0x3d4   : > { %p1738_p5 = scmp.le.s32.totalorder (!%p1164_p11), %s2972_s21, 0 }
 0x3d6   : > { %1632 = sbr.rel (%p1738_p5) target bundleno = 1020 (0x3fc), region = 178  ;;  %s3193_s22 = smov (!%p1738_p5), %s2761_s11 }
 0x3d7   : > { %s3194_s23 = smov (!%p1738_p5), %s2704_s20  ;;  %s2981_s24 = smov (!%p1738_p5), 0  }
 0x3d8   : > { %s2983_s25 = smov (!%p1738_p5), 0  }
 0x3db LB: >> { %v1366_v40 = vld [vmem:[%s2244_s23] sm:$0xff]  ;;  %v1368_v41 = vld [vmem:[%s2244_s23 + $0x8] sm:$0xff]  ;;  %v1370_v10 = vld [vmem:[%s2244_s23 + $0x10] sm:$0xff]  ;;  %s1494_s28 = sadd.s32 1, %s2248_s24  ;;  %s1360_s25 = sadd.s32 1, %s2252_s25   ;;  %s2252_s25 = sphi %s2983_s25, %s1360_s25   ;;  %s2248_s24 = sphi %s2981_s24, %s3197_s24   ;;  %s2244_s23 = sphi %s3194_s23, %s3196_s23   ;;  %s2240_s22 = sphi %s3193_s22, %s3195_s22  }
 0x3dc   : >> { %1367 = vst [vmem:[%s2240_s22] sm:$0xff] %v1366_v40  ;;  %1369 = vst [vmem:[%s2240_s22 + $0x8] sm:$0xff] %v1368_v41  ;;  %v1372_v16 = vld [vmem:[%s2244_s23 + $0x18] sm:$0xff]  ;;  %v1374_v46 = vld [vmem:[%s2244_s23 + $0x20] sm:$0xff]  ;;  %p1495_p6 = scmp.ge.s32.totalorder %s1494_s28, %s2972_s21  ;;  %p1359_p7 = scmp.ge.s32.totalorder %s1360_s25, %s2972_s21 }
 0x3dd   : >> { %1371 = vst [vmem:[%s2240_s22 + $0x10] sm:$0xff] %v1370_v10  ;;  %v1376_v18 = vld [vmem:[%s2244_s23 + $0x28] sm:$0xff]  ;;  %1373 = vst [vmem:[%s2240_s22 + $0x18] sm:$0xff] %v1372_v16  ;;  %v1378_v27 = vld [vmem:[%s2244_s23 + $0x30] sm:$0xff] }
 0x3de   : >> { %1375 = vst [vmem:[%s2240_s22 + $0x20] sm:$0xff] %v1374_v46  ;;  %1377 = vst [vmem:[%s2240_s22 + $0x28] sm:$0xff] %v1376_v18  ;;  %v1380_v48 = vld [vmem:[%s2244_s23 + $0x38] sm:$0xff]  ;;  %v1382_v22 = vld [vmem:[%s2244_s23 + $0x40] sm:$0xff]  ;;  %s3210_s28 = smov (%p1495_p6, %s1494_s28), 0 }
 0x3df   : >> { %1379 = vst [vmem:[%s2240_s22 + $0x30] sm:$0xff] %v1378_v27  ;;  %1381 = vst [vmem:[%s2240_s22 + $0x38] sm:$0xff] %v1380_v48  ;;  %v1384_v31 = vld [vmem:[%s2244_s23 + $0x48] sm:$0xff]  ;;  %v1386_v25 = vld [vmem:[%s2244_s23 + $0x50] sm:$0xff]  ;;  %s1739_s30 = sshll.u32 %s3210_s28, 9  ;;  %s3197_s24 = smov %s3210_s28 }
 0x3e0   : >> { %1383 = vst [vmem:[%s2240_s22 + $0x40] sm:$0xff] %v1382_v22  ;;  %v1388_v28 = vld [vmem:[%s2244_s23 + $0x58] sm:$0xff]  ;;  %1385 = vst [vmem:[%s2240_s22 + $0x48] sm:$0xff] %v1384_v31  ;;  %v1390_v29 = vld [vmem:[%s2244_s23 + $0x60] sm:$0xff]  ;;  %s3039_s8 = scalar_lea.vmem %s2704_s20, %s1739_s30 [#allocation3]   ;;  %s3042_s12 = scalar_lea.vmem %s2761_s11, %s1739_s30  }
 0x3e1   : >> { %1387 = vst [vmem:[%s2240_s22 + $0x50] sm:$0xff] %v1386_v25  ;;  %1389 = vst [vmem:[%s2240_s22 + $0x58] sm:$0xff] %v1388_v28  ;;  %v1392_v24 = vld [vmem:[%s2244_s23 + $0x68] sm:$0xff]  ;;  %v1394_v32 = vld [vmem:[%s2244_s23 + $0x70] sm:$0xff] }
 0x3e2   : >> { %1391 = vst [vmem:[%s2240_s22 + $0x60] sm:$0xff] %v1390_v29  ;;  %1393 = vst [vmem:[%s2240_s22 + $0x68] sm:$0xff] %v1392_v24  ;;  %v1396_v36 = vld [vmem:[%s2244_s23 + $0x78] sm:$0xff]  ;;  %v1398_v39 = vld [vmem:[%s2244_s23 + $0x80] sm:$0xff] }
 0x3e3   : >> { %1395 = vst [vmem:[%s2240_s22 + $0x70] sm:$0xff] %v1394_v32  ;;  %v1400_v19 = vld [vmem:[%s2244_s23 + $0x88] sm:$0xff]  ;;  %1397 = vst [vmem:[%s2240_s22 + $0x78] sm:$0xff] %v1396_v36  ;;  %v1402_v21 = vld [vmem:[%s2244_s23 + $0x90] sm:$0xff] }
 0x3e4   : >> { %1399 = vst [vmem:[%s2240_s22 + $0x80] sm:$0xff] %v1398_v39  ;;  %1401 = vst [vmem:[%s2240_s22 + $0x88] sm:$0xff] %v1400_v19  ;;  %v1404_v26 = vld [vmem:[%s2244_s23 + $0x98] sm:$0xff]  ;;  %v1406_v50 = vld [vmem:[%s2244_s23 + $0xa0] sm:$0xff] }
 0x3e5   : >> { %1403 = vst [vmem:[%s2240_s22 + $0x90] sm:$0xff] %v1402_v21  ;;  %1405 = vst [vmem:[%s2240_s22 + $0x98] sm:$0xff] %v1404_v26  ;;  %v1408_v51 = vld [vmem:[%s2244_s23 + $0xa8] sm:$0xff]  ;;  %v1410_v44 = vld [vmem:[%s2244_s23 + $0xb0] sm:$0xff] }
 0x3e6   : >> { %1407 = vst [vmem:[%s2240_s22 + $0xa0] sm:$0xff] %v1406_v50  ;;  %v1412_v55 = vld [vmem:[%s2244_s23 + $0xb8] sm:$0xff]  ;;  %1409 = vst [vmem:[%s2240_s22 + $0xa8] sm:$0xff] %v1408_v51  ;;  %v1414_v42 = vld [vmem:[%s2244_s23 + $0xc0] sm:$0xff] }
 0x3e7   : >> { %1411 = vst [vmem:[%s2240_s22 + $0xb0] sm:$0xff] %v1410_v44  ;;  %1413 = vst [vmem:[%s2240_s22 + $0xb8] sm:$0xff] %v1412_v55  ;;  %v1416_v58 = vld [vmem:[%s2244_s23 + $0xc8] sm:$0xff]  ;;  %v1418_v60 = vld [vmem:[%s2244_s23 + $0xd0] sm:$0xff] }
 0x3e8   : >> { %1415 = vst [vmem:[%s2240_s22 + $0xc0] sm:$0xff] %v1414_v42  ;;  %1417 = vst [vmem:[%s2240_s22 + $0xc8] sm:$0xff] %v1416_v58  ;;  %v1420_v63 = vld [vmem:[%s2244_s23 + $0xd8] sm:$0xff]  ;;  %v1422_v3 = vld [vmem:[%s2244_s23 + $0xe0] sm:$0xff] }
 0x3e9   : >> { %1419 = vst [vmem:[%s2240_s22 + $0xd0] sm:$0xff] %v1418_v60  ;;  %v1424_v5 = vld [vmem:[%s2244_s23 + $0xe8] sm:$0xff]  ;;  %1421 = vst [vmem:[%s2240_s22 + $0xd8] sm:$0xff] %v1420_v63  ;;  %v1426_v7 = vld [vmem:[%s2244_s23 + $0xf0] sm:$0xff] }
 0x3ea   : >> { %1423 = vst [vmem:[%s2240_s22 + $0xe0] sm:$0xff] %v1422_v3  ;;  %1425 = vst [vmem:[%s2240_s22 + $0xe8] sm:$0xff] %v1424_v5  ;;  %v1428_v9 = vld [vmem:[%s2244_s23 + $0xf8] sm:$0xff]  ;;  %v1430_v53 = vld [vmem:[%s2244_s23 + $0x100] sm:$0xff] }
 0x3eb   : >> { %1427 = vst [vmem:[%s2240_s22 + $0xf0] sm:$0xff] %v1426_v7  ;;  %1429 = vst [vmem:[%s2240_s22 + $0xf8] sm:$0xff] %v1428_v9  ;;  %v1432_v47 = vld [vmem:[%s2244_s23 + $0x108] sm:$0xff]  ;;  %v1434_v13 = vld [vmem:[%s2244_s23 + $0x110] sm:$0xff] }
 0x3ec   : >> { %1431 = vst [vmem:[%s2240_s22 + $0x100] sm:$0xff] %v1430_v53  ;;  %v1436_v49 = vld [vmem:[%s2244_s23 + $0x118] sm:$0xff]  ;;  %1433 = vst [vmem:[%s2240_s22 + $0x108] sm:$0xff] %v1432_v47  ;;  %v1438_v56 = vld [vmem:[%s2244_s23 + $0x120] sm:$0xff] }
 0x3ed   : >> { %1435 = vst [vmem:[%s2240_s22 + $0x110] sm:$0xff] %v1434_v13  ;;  %1437 = vst [vmem:[%s2240_s22 + $0x118] sm:$0xff] %v1436_v49  ;;  %v1440_v57 = vld [vmem:[%s2244_s23 + $0x128] sm:$0xff]  ;;  %v1442_v52 = vld [vmem:[%s2244_s23 + $0x130] sm:$0xff] }
 0x3ee   : >> { %1439 = vst [vmem:[%s2240_s22 + $0x120] sm:$0xff] %v1438_v56  ;;  %1441 = vst [vmem:[%s2240_s22 + $0x128] sm:$0xff] %v1440_v57  ;;  %v1444_v59 = vld [vmem:[%s2244_s23 + $0x138] sm:$0xff]  ;;  %v1446_v54 = vld [vmem:[%s2244_s23 + $0x140] sm:$0xff] }
 0x3ef   : >> { %1443 = vst [vmem:[%s2240_s22 + $0x130] sm:$0xff] %v1442_v52  ;;  %v1448_v17 = vld [vmem:[%s2244_s23 + $0x148] sm:$0xff]  ;;  %1445 = vst [vmem:[%s2240_s22 + $0x138] sm:$0xff] %v1444_v59  ;;  %v1450_v35 = vld [vmem:[%s2244_s23 + $0x150] sm:$0xff] }
 0x3f0   : >> { %1447 = vst [vmem:[%s2240_s22 + $0x140] sm:$0xff] %v1446_v54  ;;  %1449 = vst [vmem:[%s2240_s22 + $0x148] sm:$0xff] %v1448_v17  ;;  %v1452_v62 = vld [vmem:[%s2244_s23 + $0x158] sm:$0xff]  ;;  %v1454_v61 = vld [vmem:[%s2244_s23 + $0x160] sm:$0xff] }
 0x3f1   : >> { %1451 = vst [vmem:[%s2240_s22 + $0x150] sm:$0xff] %v1450_v35  ;;  %1453 = vst [vmem:[%s2240_s22 + $0x158] sm:$0xff] %v1452_v62  ;;  %v1456_v1 = vld [vmem:[%s2244_s23 + $0x168] sm:$0xff]  ;;  %v1458_v0 = vld [vmem:[%s2244_s23 + $0x170] sm:$0xff] }
 0x3f2   : >> { %1455 = vst [vmem:[%s2240_s22 + $0x160] sm:$0xff] %v1454_v61  ;;  %v1460_v4 = vld [vmem:[%s2244_s23 + $0x178] sm:$0xff]  ;;  %1457 = vst [vmem:[%s2240_s22 + $0x168] sm:$0xff] %v1456_v1  ;;  %v1462_v8 = vld [vmem:[%s2244_s23 + $0x180] sm:$0xff] }
 0x3f3   : >> { %1459 = vst [vmem:[%s2240_s22 + $0x170] sm:$0xff] %v1458_v0  ;;  %1461 = vst [vmem:[%s2240_s22 + $0x178] sm:$0xff] %v1460_v4  ;;  %v1464_v33 = vld [vmem:[%s2244_s23 + $0x188] sm:$0xff]  ;;  %v1466_v2 = vld [vmem:[%s2244_s23 + $0x190] sm:$0xff] }
 0x3f4   : >> { %1463 = vst [vmem:[%s2240_s22 + $0x180] sm:$0xff] %v1462_v8  ;;  %1465 = vst [vmem:[%s2240_s22 + $0x188] sm:$0xff] %v1464_v33  ;;  %v1468_v43 = vld [vmem:[%s2244_s23 + $0x198] sm:$0xff]  ;;  %v1470_v6 = vld [vmem:[%s2244_s23 + $0x1a0] sm:$0xff] }
 0x3f5   : >> { %1467 = vst [vmem:[%s2240_s22 + $0x190] sm:$0xff] %v1466_v2  ;;  %v1472_v14 = vld [vmem:[%s2244_s23 + $0x1a8] sm:$0xff]  ;;  %1469 = vst [vmem:[%s2240_s22 + $0x198] sm:$0xff] %v1468_v43  ;;  %v1474_v37 = vld [vmem:[%s2244_s23 + $0x1b0] sm:$0xff] }
 0x3f6   : >> { %1471 = vst [vmem:[%s2240_s22 + $0x1a0] sm:$0xff] %v1470_v6  ;;  %1473 = vst [vmem:[%s2240_s22 + $0x1a8] sm:$0xff] %v1472_v14  ;;  %v1476_v12 = vld [vmem:[%s2244_s23 + $0x1b8] sm:$0xff]  ;;  %v1478_v45 = vld [vmem:[%s2244_s23 + $0x1c0] sm:$0xff] }
 0x3f7   : >> { %1475 = vst [vmem:[%s2240_s22 + $0x1b0] sm:$0xff] %v1474_v37  ;;  %1477 = vst [vmem:[%s2240_s22 + $0x1b8] sm:$0xff] %v1476_v12  ;;  %v1480_v23 = vld [vmem:[%s2244_s23 + $0x1c8] sm:$0xff]  ;;  %v1482_v11 = vld [vmem:[%s2244_s23 + $0x1d0] sm:$0xff]  ;;  %1362 = sbr.rel (!%p1359_p7) target bundleno = 987 (0x3db), region = 184 }
 0x3f8   : >> { %1479 = vst [vmem:[%s2240_s22 + $0x1c0] sm:$0xff] %v1478_v45  ;;  %v1484_v34 = vld [vmem:[%s2244_s23 + $0x1d8] sm:$0xff]  ;;  %1481 = vst [vmem:[%s2240_s22 + $0x1c8] sm:$0xff] %v1480_v23  ;;  %v1486_v20 = vld [vmem:[%s2244_s23 + $0x1e0] sm:$0xff] }
 0x3f9   : >> { %1483 = vst [vmem:[%s2240_s22 + $0x1d0] sm:$0xff] %v1482_v11  ;;  %1485 = vst [vmem:[%s2240_s22 + $0x1d8] sm:$0xff] %v1484_v34  ;;  %v1488_v15 = vld [vmem:[%s2244_s23 + $0x1e8] sm:$0xff]  ;;  %v1490_v30 = vld [vmem:[%s2244_s23 + $0x1f0] sm:$0xff] }
 0x3fa   : >> { %1487 = vst [vmem:[%s2240_s22 + $0x1e0] sm:$0xff] %v1486_v20  ;;  %1489 = vst [vmem:[%s2240_s22 + $0x1e8] sm:$0xff] %v1488_v15  ;;  %v1492_v38 = vld [vmem:[%s2244_s23 + $0x1f8] sm:$0xff]  ;;  %s3196_s23 = smov %s3039_s8 }
 0x3fb   : >> { %1491 = vst [vmem:[%s2240_s22 + $0x1f0] sm:$0xff] %v1490_v30  ;;  %1493 = vst [vmem:[%s2240_s22 + $0x1f8] sm:$0xff] %v1492_v38  ;;  %s3195_s22 = smov %s3042_s12 }
 0x3fc PF: > { %s3148_s19 = sand.u32 63, %s1353_s15   ;;  %s1754_s18 = sshll.u32 %s2972_s21, 13 }
 0x3fd   : > { %s1505_s6 = sshra.s32 %s1754_s18, 4  ;;  %p1744_p8 = scmp.le.s32.totalorder %s3148_s19, 0 }
 0x3fe   : > { %s1506_s13 = scalar_lea.vmem %s2704_s20, %s1505_s6 [#allocation3]   ;;  %s1509_s30 = scalar_lea.vmem %s2761_s11, %s1505_s6  }
 0x3ff   : > { %1646 = sbr.rel (%p1744_p8) target bundleno = 1036 (0x40c), region = 189  ;;  %s2254_s8 = smov (!%p1744_p8), %s1509_s30  }
 0x400   : > { %s2258_s28 = smov (!%p1744_p8), %s1506_s13   ;;  %s2262_s12 = smov (!%p1744_p8), 0  }
 0x401   : > { %s2266_s25 = smov (!%p1744_p8), 0  }
 0x404 LB: >> { %v1521_v40 = vld [vmem:[%s2260_s28] sm:$0xff]  ;;  %s1523_s15 = sadd.s32 1, %s2264_s12  ;;  %s1515_s25 = sadd.s32 1, %s2268_s25   ;;  %s2268_s25 = sphi %s2266_s25, %s1515_s25   ;;  %s2264_s12 = sphi %s2262_s12, %s2263_s12   ;;  %s2260_s28 = sphi %s2258_s28, %s1528_s28   ;;  %s2256_s8 = sphi %s2254_s8, %s1529_s8  }
 0x405   : >> { %1522 = vst [vmem:[%s2256_s8] sm:$0xff] %v1521_v40  ;;  %p1524_p9 = scmp.ge.s32.totalorder %s1523_s15, %s3148_s19  ;;  %p1514_p10 = scmp.ge.s32.totalorder %s1515_s25, %s3148_s19 }
 0x407   : >> { %s3212_s15 = smov (%p1524_p9, %s1523_s15), 0  ;;  %1517 = sbr.rel (!%p1514_p10) target bundleno = 1028 (0x404), region = 195 }
 0x408   : >> { %s1745_s21 = sshll.u32 %s3212_s15, 3  ;;  %s2263_s12 = smov %s3212_s15  }
 0x409   : >> { %s1528_s28 = scalar_lea.vmem %s1506_s13, %s1745_s21 [#allocation3]   ;;  %s1529_s8 = scalar_lea.vmem %s1509_s30, %s1745_s21  }
 0x40c PF: > { %s2270_s22 = smov 1  }
 0x40d   : > { %s1530_s23 = sshll.u32 %s2270_s22, %s2768_s10 }
 0x40e   : > { %s1747_s24 = sadd.s32 4294967295, %s1530_s23 }
 0x40f   : > { %v1540_v41 = vld [vmem:[%s1350_s16] sm:%s1747_s24] }
 0x410   : > { %1541 = vst [vmem:[%s1352_s26] sm:%s1747_s24] %v1540_v41 }
 0x411 PF: > { %p1748_p11 = scmp.ge.u32.totalorder %s3204_s17, 8 }
 0x412   : > { %s2271_s18 = smov (!%p1748_p11), 1  }
 0x413   : > { %1150 = sbr.rel (%p1748_p11) target bundleno = 1050 (0x41a), region = 64  ;;  %s1151_s19 = sshll.u32 (!%p1748_p11), %s2271_s18, %s3204_s17 }
 0x414   : > { %s1749_s6 = sadd.s32 (!%p1748_p11), 4294967295, %s1151_s19 }
 0x418   : > { %v1161_v10 = vld [vmem:[%s2704_s20] sm:%s1749_s6] }
 0x419   : > { %1162 = vst [vmem:[%s2761_s11] sm:%s1749_s6] %v1161_v10 }
 0x41a PF: > { %p15_p12 = scmp.ge.s32.totalorder %s2330_s29, 4   ;;  %s3198_s26 = smov %s2200_s27 }
 0x41b   : > { %s3199_s27 = smov %s2338_s9  ;;  %s3200_s28 = smov %s2330_s29 }
 0x41c   :  { %17 = sbr.rel (!%p15_p12) target bundleno = 4 (0x4), region = 206 }

</bundles_post_ra>
